<compile_context>
chip_gen: v7x
topology: tpu7x:2x2x1
jax: 0.10.0
libtpu: 0.0.40
codegen_flags: <defaults>
</compile_context>

<pallas_src>
import functools
import math

import jax
import jax.numpy as jnp
from jax.experimental import pallas as pl
from jax.experimental.pallas import tpu as pltpu


NUM_BLOCKS = [2, 2, 2, 2]   # ResNet-18
NUM_CLASSES = 10
CPAD = 128                  # minimum physical width for STORED activations (lane-dense stores)


def _round_up(x, m):
    return ((x + m - 1) // m) * m


@functools.lru_cache(maxsize=1)
def _wide_mxu():
    """True on chips with a 256x256 MXU (v6e/v7x); v5e prefers 128-wide N tiles."""
    try:
        name = str(pltpu.get_tpu_info().chip_version).lower()
        return "v5" not in name
    except Exception:
        return True


# ----------------------------- Pallas kernels -----------------------------

def _conv_bn_kernel(*refs, mode, apply_relu):
    """Single-pass fused (im2col-matmul) + BN + shortcut + ReLU kernel.

    Grid = (M-tiles, N-tiles); full K per tile (no accumulator revisit).
    inputs:
      x (tm,K) bf16, w (K,tn) bf16, scale (1,tn) f32, bias (1,tn) f32,
      [sc (tm,tn) bf16]                                        if mode == 'add'
      [xs (tm,Ks) bf16, ws (Ks,tn) bf16, ss (1,tn), bs (1,tn)] if mode == 'proj'
    output: o (tm,tn) bf16
    """
    x_ref, w_ref, s_ref, b_ref = refs[:4]
    o_ref = refs[-1]

    out = jnp.dot(x_ref[...], w_ref[...], preferred_element_type=jnp.float32)
    out = out * s_ref[...] + b_ref[...]
    if mode == 'add':
        out = out + refs[4][...].astype(jnp.float32)
    elif mode == 'proj':
        xs_ref, ws_ref, ss_ref, bs_ref = refs[4:8]
        sc = jnp.dot(xs_ref[...], ws_ref[...],
                     preferred_element_type=jnp.float32)
        out = out + sc * ss_ref[...] + bs_ref[...]
    if apply_relu:
        out = jnp.maximum(out, 0.0)
    o_ref[...] = out.astype(o_ref.dtype)


def conv_bn(x, w, scale, bias, *, relu, shortcut=None, proj=None):
    """(x @ w) * scale + bias [+ shortcut] [+ ReLU].

    x: (M, K) bf16 im2col patches.  w: (K, N) bf16.  scale/bias: (1, N) f32.
    shortcut: (M, N) bf16 identity residual, OR
    proj: (xs (M,Ks) bf16, ws (Ks,N) bf16, ss (1,N) f32, bs (1,N) f32).
    Returns (M, N) bf16.
    """
    M, K = x.shape
    N = w.shape[1]

    # ---- N tiling: 256 fills the 256x256 MXU on v6e/v7x; 128 on v5e ----
    if N <= 128:
        tn = N
    else:
        tn = 256 if _wide_mxu() else 128
    n_tiles_n = N // tn

    # ---- M tiling: largest power-of-two divisor of M up to 1024 (working
    # sets stay far below scoped VMEM on every generation, incl. v7x), then
    # keep >=2 total grid steps so both v7x TensorCores get work.
    tm = None
    for cand in (1024, 512, 256, 128, 64, 32, 16, 8):
        if cand <= M and M % cand == 0:
            tm = cand
            break
    if tm is None:
        tm = min(1024, _round_up(M, 8))          # ragged-M fallback (pads)
    elif n_tiles_n * (M // tm) < 2 and tm >= 16:
        tm //= 2
    Mp = _round_up(M, tm)

    def _pad_m(a):
        if a is None or Mp == M:
            return a
        return jnp.pad(a, ((0, Mp - M), (0, 0)))

    in_arrays = [_pad_m(x), w, scale, bias]
    in_specs = [
        pl.BlockSpec((tm, K), lambda i, j: (i, 0)),
        pl.BlockSpec((K, tn), lambda i, j: (0, j)),
        pl.BlockSpec((1, tn), lambda i, j: (0, j)),
        pl.BlockSpec((1, tn), lambda i, j: (0, j)),
    ]
    if shortcut is not None:
        mode = 'add'
        in_arrays.append(_pad_m(shortcut))
        in_specs.append(pl.BlockSpec((tm, tn), lambda i, j: (i, j)))
    elif proj is not None:
        mode = 'proj'
        xs, ws, ss, bs = proj
        Ks = ws.shape[0]
        in_arrays += [_pad_m(xs), ws, ss, bs]
        in_specs += [
            pl.BlockSpec((tm, Ks), lambda i, j: (i, 0)),
            pl.BlockSpec((Ks, tn), lambda i, j: (0, j)),
            pl.BlockSpec((1, tn), lambda i, j: (0, j)),
            pl.BlockSpec((1, tn), lambda i, j: (0, j)),
        ]
    else:
        mode = 'plain'

    kern = functools.partial(_conv_bn_kernel, mode=mode, apply_relu=relu)
    out = pl.pallas_call(
        kern,
        out_shape=jax.ShapeDtypeStruct((Mp, N), jnp.bfloat16),
        grid=(Mp // tm, N // tn),
        in_specs=in_specs,
        out_specs=pl.BlockSpec((tm, tn), lambda i, j: (i, j)),
        compiler_params=pltpu.CompilerParams(
            dimension_semantics=("parallel", "parallel")),
    )(*in_arrays)

    if Mp != M:
        out = out[:M]
    return out


def _pool_linear_kernel(x_ref, w_ref, b_ref, o_ref, *, inv_p):
    # x: (B, P, C) bf16 -> global-average-pool over P, then @ (C, Npad) + bias.
    pooled = jnp.sum(x_ref[...].astype(jnp.float32), axis=1) * inv_p
    o_ref[...] = (jnp.dot(pooled.astype(jnp.bfloat16), w_ref[...],
                          preferred_element_type=jnp.float32) + b_ref[...])


def pool_linear(x, w, b):
    """x: (B, P, C) bf16; w: (C, Npad) bf16; b: (1, Npad) f32 -> (B, Npad) f32."""
    B, P, C = x.shape
    N = w.shape[1]
    kern = functools.partial(_pool_linear_kernel, inv_p=1.0 / P)
    return pl.pallas_call(
        kern,
        out_shape=jax.ShapeDtypeStruct((B, N), jnp.float32),
        grid=(1,),
        in_specs=[pl.BlockSpec((B, P, C), lambda i: (0, 0, 0)),
                  pl.BlockSpec((C, N), lambda i: (0, 0)),
                  pl.BlockSpec((1, N), lambda i: (0, 0))],
        out_specs=pl.BlockSpec((B, N), lambda i: (0, 0)),
    )(x, w, b)


# ------------------------------- glue (JAX) -------------------------------

def _im2col(x, ksize=3, stride=1, pad=1):
    """x: (B, H, W, C) NHWC -> patches (B*Ho*Wo, k*k*C) in (kh, kw, c) order."""
    B, H, W, C = x.shape
    xp = jnp.pad(x, ((0, 0), (pad, pad), (pad, pad), (0, 0)))
    Ho = (H + 2 * pad - ksize) // stride + 1
    Wo = (W + 2 * pad - ksize) // stride + 1
    cols = []
    for i in range(ksize):
        for j in range(ksize):
            cols.append(xp[:, i:i + stride * Ho:stride,
                           j:j + stride * Wo:stride, :])
    patches = jnp.stack(cols, axis=3)                  # (B, Ho, Wo, k*k, C)
    return patches.reshape(B * Ho * Wo, ksize * ksize * C), Ho, Wo


class _Keys:
    def __init__(self, seed):
        self._key = jax.random.PRNGKey(seed)

    def __call__(self):
        self._key, sub = jax.random.split(self._key)
        return sub


def _phys(c):
    return max(c, CPAD)


def _conv_weight(kg, cout, cin, k, cout_phys, k_pad=None):
    """PyTorch (Cout,Cin,kh,kw) init -> (k*k*cin [padded to k_pad], cout_phys) bf16."""
    std = 1.0 / math.sqrt(cin * k * k)
    w = std * jax.random.normal(kg(), (cout, cin, k, k), dtype=jnp.float32)
    w = jnp.transpose(w, (2, 3, 1, 0))                 # (kh, kw, cin, cout)
    w = jnp.pad(w, ((0, 0), (0, 0), (0, 0), (0, cout_phys - cout)))
    w = w.reshape(k * k * cin, cout_phys)
    if k_pad is not None and k_pad > k * k * cin:
        w = jnp.pad(w, ((0, k_pad - k * k * cin), (0, 0)))
    return w.astype(jnp.bfloat16)


def _bn_folded(kg, c, c_phys, eps=1e-5):
    gamma = 1.0 + 0.1 * jax.random.normal(kg(), (c,), dtype=jnp.float32)
    beta = 0.1 * jax.random.normal(kg(), (c,), dtype=jnp.float32)
    mean = 0.1 * jax.random.normal(kg(), (c,), dtype=jnp.float32)
    var = 1.0 + 0.1 * jax.random.uniform(kg(), (c,), dtype=jnp.float32)
    scale = gamma / jnp.sqrt(var + eps)
    bias = beta - mean * scale
    scale = jnp.pad(scale, (0, c_phys - c))   # padded channels stay exactly 0
    bias = jnp.pad(bias, (0, c_phys - c))
    return scale.reshape(1, c_phys), bias.reshape(1, c_phys)


def init_resnet_params(seed=0, num_blocks=NUM_BLOCKS, num_classes=NUM_CLASSES):
    kg = _Keys(seed)
    params = {
        # stem: true Cin=3 (K = 27 padded to 32); Cout 64 padded to 128 lanes.
        'conv1_w': _conv_weight(kg, 64, 3, 3, cout_phys=_phys(64), k_pad=32),
        'bn1': _bn_folded(kg, 64, _phys(64)),
        'stem_kpad': 32,
    }
    in_planes = 64
    layers = []
    for planes, nb, stride0 in zip((64, 128, 256, 512), num_blocks, (1, 2, 2, 2)):
        blocks = []
        for stride in [stride0] + [1] * (nb - 1):
            blk = {
                'stride': stride,
                'cin': in_planes,       # TRUE input channels (K uses no padding)
                'planes': planes,       # TRUE output channels
                'w1': _conv_weight(kg, planes, in_planes, 3,
                                   cout_phys=_phys(planes)),
                'bn1': _bn_folded(kg, planes, _phys(planes)),
                'w2': _conv_weight(kg, planes, planes, 3,
                                   cout_phys=_phys(planes)),
                'bn2': _bn_folded(kg, planes, _phys(planes)),
            }
            if stride != 1 or in_planes != planes:
                blk['ws'] = _conv_weight(kg, planes, in_planes, 1,
                                         cout_phys=_phys(planes))
                blk['bns'] = _bn_folded(kg, planes, _phys(planes))
            blocks.append(blk)
            in_planes = planes
        layers.append(blocks)
    params['layers'] = layers
    # Linear head: pad 10 -> 128 output classes for a lane-dense store.
    std = 1.0 / math.sqrt(512)
    lw = std * jax.random.normal(kg(), (512, num_classes), dtype=jnp.float32)
    lb = std * jax.random.normal(kg(), (1, num_classes), dtype=jnp.float32)
    ncls_pad = _round_up(num_classes, 128)
    params['lin_w'] = jnp.pad(
        lw, ((0, 0), (0, ncls_pad - num_classes))).astype(jnp.bfloat16)
    params['lin_b'] = jnp.pad(lb, ((0, 0), (0, ncls_pad - num_classes)))
    params['num_classes'] = num_classes
    return params


def basic_block(x, blk):
    """x: (B, H, W, C_stored) NHWC bf16 -> (B, Ho, Wo, planes_stored) bf16."""
    B, H, W, Cs = x.shape
    stride = blk['stride']
    cin = blk['cin']
    planes = blk['planes']
    # Drop lane-padding before building patches: K uses the TRUE channels.
    x_true = x[..., :cin] if Cs > cin else x
    # conv1 (3x3, stride s) + bn1 + relu
    p1, Ho, Wo = _im2col(x_true, ksize=3, stride=stride, pad=1)
    s1, b1 = blk['bn1']
    out = conv_bn(p1, blk['w1'], s1, b1, relu=True)
    c_stored = out.shape[1]
    out_img = out.reshape(B, Ho, Wo, c_stored)
    out_true = out_img[..., :planes] if c_stored > planes else out_img
    # conv2 (3x3, stride 1) + bn2 + shortcut + relu, all fused in one kernel
    p2, _, _ = _im2col(out_true, ksize=3, stride=1, pad=1)
    s2, b2 = blk['bn2']
    if 'ws' in blk:
        xs = x_true[:, ::stride, ::stride, :].reshape(B * Ho * Wo, cin)
        ss, bs = blk['bns']
        out2 = conv_bn(p2, blk['w2'], s2, b2, relu=True,
                       proj=(xs, blk['ws'], ss, bs))
    else:
        sc = x.reshape(B * Ho * Wo, Cs)      # stored width == output width here
        out2 = conv_bn(p2, blk['w2'], s2, b2, relu=True, shortcut=sc)
    return out2.reshape(B, Ho, Wo, -1)


def resnet_forward(x_nchw, params):
    """x_nchw: (B, 3, H, W) float32 (PyTorch NCHW) -> logits (B, num_classes)."""
    x = jnp.transpose(x_nchw, (0, 2, 3, 1)).astype(jnp.bfloat16)  # NHWC bf16
    B = x.shape[0]
    # stem: conv1 + bn1 + relu (K = 27 padded to 32; Cout padded 64 -> 128)
    p, Ho, Wo = _im2col(x, ksize=3, stride=1, pad=1)
    kpad = params['stem_kpad']
    if p.shape[1] < kpad:
        p = jnp.pad(p, ((0, 0), (0, kpad - p.shape[1])))
    s0, b0 = params['bn1']
    out = conv_bn(p, params['conv1_w'], s0, b0, relu=True)
    x = out.reshape(B, Ho, Wo, -1)
    # residual layers
    for layer in params['layers']:
        for blk in layer:
            x = basic_block(x, blk)
    # F.avg_pool2d(out, 4) + view + linear (fused); exact only for a 4x4 map.
    Bx, H, W, C = x.shape
    assert H == 4 and W == 4, (
        "fused pool_linear matches F.avg_pool2d(out, 4) only for a 4x4 final "
        "feature map (i.e. 32x32 input)")
    logits = pool_linear(x.reshape(Bx, H * W, C), params['lin_w'],
                         params['lin_b'])
    return logits[:, :params['num_classes']]


if __name__ == "__main__":
    key = jax.random.PRNGKey(0)
    # CIFAR-10 shape: smallest spatial size compatible with F.avg_pool2d(out, 4)
    # after three stride-2 stages; keep batch small.
    x = jax.random.normal(key, (2, 3, 32, 32), dtype=jnp.float32)  # NCHW
    params = init_resnet_params(seed=0)
    logits = resnet_forward(x, params)
    logits = jax.block_until_ready(logits)
    assert logits.shape == (2, NUM_CLASSES)
    assert bool(jnp.all(jnp.isfinite(logits)))
    print("KERNEL_OK")
</pallas_src>

<mosaic_0001>
module attributes {stable_mosaic.version = 11 : i64} {
  func.func @_conv_bn_kernel(%arg0: i32, %arg1: i32, %arg2: memref<1024x32xbf16, #tpu.memory_space<vmem>>, %arg3: memref<32x128xbf16, #tpu.memory_space<vmem>>, %arg4: memref<1x128xf32, #tpu.memory_space<vmem>>, %arg5: memref<1x128xf32, #tpu.memory_space<vmem>>, %arg6: memref<1024x128xbf16, #tpu.memory_space<vmem>>) attributes {dimension_semantics = [#tpu.dimension_semantics<parallel>, #tpu.dimension_semantics<parallel>], iteration_bounds = array<i64: 2, 1>, scalar_prefetch = 0 : i64, scratch_operands = 0 : i64, tpu.core_type = #tpu.core_type<tc>, window_params = [{transform_indices = @transform_0, window_bounds = array<i64: 1024, 32>}, {transform_indices = @transform_1, window_bounds = array<i64: 32, 128>}, {transform_indices = @transform_2, window_bounds = array<i64: 1, 128>}, {transform_indices = @transform_3, window_bounds = array<i64: 1, 128>}, {transform_indices = @transform_4, window_bounds = array<i64: 1024, 128>}]} {
    %c0 = arith.constant 0 : index
    %c0_0 = arith.constant 0 : index
    %0 = vector.load %arg2[%c0, %c0_0] : memref<1024x32xbf16, #tpu.memory_space<vmem>>, vector<1024x32xbf16>
    %c0_1 = arith.constant 0 : index
    %c0_2 = arith.constant 0 : index
    %1 = vector.load %arg3[%c0_1, %c0_2] : memref<32x128xbf16, #tpu.memory_space<vmem>>, vector<32x128xbf16>
    %cst = arith.constant dense<0.000000e+00> : vector<1024x128xf32>
    %2 = tpu.matmul %0, %1, %cst {dimension_numbers = #tpu.dot_dimension_numbers<[1], [0], [0], [1], [0, 0, 1, 1], [], []>} : vector<1024x32xbf16>, vector<32x128xbf16>, vector<1024x128xf32> -> vector<1024x128xf32>
    %c0_3 = arith.constant 0 : index
    %c0_4 = arith.constant 0 : index
    %3 = vector.load %arg4[%c0_3, %c0_4] : memref<1x128xf32, #tpu.memory_space<vmem>>, vector<1x128xf32>
    %4 = vector.broadcast %3 : vector<1x128xf32> to vector<1024x128xf32>
    %5 = arith.mulf %2, %4 : vector<1024x128xf32>
    %c0_5 = arith.constant 0 : index
    %c0_6 = arith.constant 0 : index
    %6 = vector.load %arg5[%c0_5, %c0_6] : memref<1x128xf32, #tpu.memory_space<vmem>>, vector<1x128xf32>
    %7 = vector.broadcast %6 : vector<1x128xf32> to vector<1024x128xf32>
    %8 = arith.addf %5, %7 : vector<1024x128xf32>
    %cst_7 = arith.constant 0.000000e+00 : f32
    %9 = vector.broadcast %cst_7 : f32 to vector<1024x128xf32>
    %10 = arith.maximumf %8, %9 : vector<1024x128xf32>
    %11 = arith.truncf %10 : vector<1024x128xf32> to vector<1024x128xbf16>
    %c0_8 = arith.constant 0 : index
    %c0_9 = arith.constant 0 : index
    %12 = vector.load %arg6[%c0_8, %c0_9] : memref<1024x128xbf16, #tpu.memory_space<vmem>>, vector<1024x128xbf16>
    tpu.vector_store %arg6[%c0_8, %c0_9], %11 {strides = array<i32>} : memref<1024x128xbf16, #tpu.memory_space<vmem>>, vector<1024x128xbf16>,
    return
  }
  func.func @transform_0(%arg0: i32, %arg1: i32) -> (i32, i32) {
    %c0_i32 = arith.constant 0 : i32
    %c0_i32_0 = arith.constant 0 : i32
    return %arg0, %c0_i32 : i32, i32
  }
  func.func @transform_1(%arg0: i32, %arg1: i32) -> (i32, i32) {
    %c0_i32 = arith.constant 0 : i32
    %c0_i32_0 = arith.constant 0 : i32
    return %c0_i32, %arg1 : i32, i32
  }
  func.func @transform_2(%arg0: i32, %arg1: i32) -> (i32, i32) {
    %c0_i32 = arith.constant 0 : i32
    %c0_i32_0 = arith.constant 0 : i32
    return %c0_i32, %arg1 : i32, i32
  }
  func.func @transform_3(%arg0: i32, %arg1: i32) -> (i32, i32) {
    %c0_i32 = arith.constant 0 : i32
    %c0_i32_0 = arith.constant 0 : i32
    return %c0_i32, %arg1 : i32, i32
  }
  func.func @transform_4(%arg0: i32, %arg1: i32) -> (i32, i32) {
    %c0_i32 = arith.constant 0 : i32
    return %arg0, %arg1 : i32, i32
  }
}

</mosaic_0001>

<bundles_post_ra>
// kernel: tpu_custom_call.1
= control target key start
LH: loop header
LB: loop body
LE: loop exit
PB: predicated region body
PF: predicated region fallthrough
CT: control target
= control target key end

     0   :  { %9 = vsyncpa [#allocation3], 0  ;;  %s4445_s0 = inlined_call_operand.vmem [shape: bf16[2048,32], index: 0, kind: input, shape index: {}]   ;;  %s4446_s1 = inlined_call_operand.vmem [shape: bf16[32,128], index: 1, kind: input, shape index: {}]   ;;  %s4447_s2 = inlined_call_operand.vmem [shape: f32[1,128], index: 2, kind: input, shape index: {}]   ;;  %s4448_s3 = inlined_call_operand.vmem [shape: f32[1,128], index: 3, kind: input, shape index: {}]   ;;  %s4449_s4 = inlined_call_operand.hbm [shape: bf16[2048,128], index: 4, kind: output, shape index: {}]  }
   0x1   :  { %11 = vsyncpa [#allocation3 + $0x1], 0  ;;  %s3848_s15 = smov 0   ;;  %s3850_s16 = smov 0  }
   0x2   :  { %s3852_s17 = smov 0   ;;  %s3854_s18 = smov 0  }
   0x3   :  { %s3856_s19 = smov 0   ;;  %s3858_s20 = smov 0  }
   0x4 LB: > { %s2625_s21 = sadd.s32 4294967295, %s3818_s20   ;;  %s2626_s22 = sadd.s32 4294967294, %s3818_s20   ;;  %s3818_s20 = sphi %s3858_s20, %s17_s20   ;;  %s3814_s19 = sphi %s3856_s19, %s4456_s19   ;;  %s3810_s18 = sphi %s3854_s18, %s4455_s18   ;;  %s3806_s17 = sphi %s3852_s17, %s4454_s17   ;;  %s3802_s16 = sphi %s3850_s16, %s4453_s16   ;;  %s3798_s15 = sphi %s3848_s15, %s4452_s15  }
   0x5   : > { %s29_s23 = sadd.s32 1, %s3814_s19  ;;  %s142_s24 = sadd.s32 1, %s3806_s17 }
   0x6   : > { %p31_p0 = scmp.ge.s32.totalorder %s29_s23, 2  ;;  %p152_p1 = scmp.ne.s32.totalorder %s3806_s17, %s3802_s16 }
   0x7   : > { %p153_p2 = scmp.eq.s32.totalorder %s2625_s21, 1  ;;  %p158_p3 = scmp.ne.s32.totalorder %s3802_s16, %s3798_s15 }
   0x8   : > { %s4458_s23 = smov (%p31_p0, %s29_s23), 0  ;;  %p159_p5 = scmp.eq.s32.totalorder %s2626_s22, 1 }
   0x9   : > { %p3888_p4 = por %p153_p2, %p152_p1  ;;  %s137_s26 = ssub.s32 %s3814_s19, %s4458_s23 }
   0xa   : > { %p2632_p6 = scmp.ge.s32.totalorder %s3818_s20, 1  ;;  %p140_p7 = scmp.eq.s32.totalorder %s137_s26, 0 }
   0xb   : > { %p3895_p8 = por %p159_p5, %p158_p3  ;;  %p205_p9 = scmp.lt.s32.totalorder %s3818_s20, 3 }
   0xc   : > { %s3901_s28 = scalar_select %p140_p7, %s3806_s17, %s142_s24  }
   0xd   : > { %p206_p10 = pnand %p2632_p6, %p205_p9 }
   0xe   : > { %v3672_v0 = vld [vmem:[%s4446_s1] sm:$0xff] (!%p206_p10)   ;;  %s2634_s5 = sshll.u32 (!%p206_p10), %s3810_s18, 7  ;;  %v3673_v1 = vld [vmem:[%s4446_s1 + $0x8] sm:$0xff] (!%p206_p10)   ;;  %vm723_vm0 = vcmask (!%p206_p10), 261120   ;;  %s238_s22 = sand.u32 (!%p206_p10), 1, %s3802_s16  }
   0xf   : > { %209 = sbr.rel (%p206_p10) target bundleno = 387 (0x183), region = 36  ;;  %p242_p11 = scmp.lt.s32.totalorder (!%p206_p10), %s2634_s5, 255  ;;  %3479 = vmatprep.subr.bf16.mxu0 (!%p206_p10), %v3672_v0  ;;  %3611 = vmatprep.subr.bf16.mxu1 (!%p206_p10), %v3672_v0 }
  0x10   : > { %3480 = vmatpush3.bf16.msra.mxu0 (!%p206_p10), %v3672_v0  ;;  %3613 = vmatpush3.bf16.msra.mxu1 (!%p206_p10), %v3672_v0  ;;  %s2633_s24 = sshll.u32 (!%p206_p10), %s238_s22, 9  ;;  %s3029_s7 = sshll.u32 (!%p206_p10), %s3810_s18, 13 }
  0x11   : > { %3481 = vmatprep.subr.bf16.mxu0 (!%p206_p10), %v3673_v1  ;;  %3612 = vmatprep.subr.bf16.mxu1 (!%p206_p10), %v3673_v1  ;;  %s4075_s26 = scalar_lea.vmem (!%p206_p10), [#allocation2], %s2633_s24  ;;  %s4399_s18 = scalar_lea.sflag (!%p206_p10), [#allocation3], %s238_s22 }
  0x12   : > { %s3820_s13 = smov (!%p206_p10), [#allocation2]  }
  0x13   : > { %s3744_s14 = sshll.u32 (!%p206_p10), %s3820_s13, 4  ;;  %s3745_s14 = int_to_ptr.vmem [resolvable:$false] %s3744_s14 }
  0x14   : > { %3482 = vmatpush3.bf16.msra.mxu0 (!%p206_p10), %v3673_v1  ;;  %3614 = vmatpush3.bf16.msra.mxu1 (!%p206_p10), %v3673_v1  ;;  %s3746_s21 = scalar_lea.vmem (!%p206_p10), %s3745_s14, 16384 }
  0x16   : > { %s4460_s5 = smov (!%p242_p11, %s2634_s5), 255 }
  0x17   : > { %s2635_s8 = sshll.u32 %s4460_s5, 2 }
  0x18   : > { %s3913_s11 = scalar_lea.vmem %s4445_s0, %s2635_s8  ;;  %s2514_s8 = sshll.u32 %s4075_s26, 4  ;;  %s4391_s8 = int_to_ptr.vmem [resolvable:$true] %s2514_s8 }
  0x19   : > { %v3674_v2 = vld [vmem:[%s3913_s11] sm:$0xff]   ;;  %v3676_v4 = vld [vmem:[%s3913_s11 + $0x8] sm:$0xff]   ;;  %v3678_v6 = vld [vmem:[%s3913_s11 + $0x10] sm:$0xff]   ;;  %s3740_s12 = scalar_lea.vmem %s4391_s8, 8192  ;;  %p3747_p1 = scmp.lt.s32.totalorder %s4391_s8, %s3745_s14 }
  0x1a   : > { %v3675_v3 = vld [vmem:[%s3913_s11 + $0x100] sm:$0xff]   ;;  %3483 = vmatprep.mubr.msk.bf16.mxu0 %vm723_vm0, %v3674_v2  ;;  %v3677_v5 = vld [vmem:[%s3913_s11 + $0x108] sm:$0xff]   ;;  %v3679_v7 = vld [vmem:[%s3913_s11 + $0x110] sm:$0xff]   ;;  %p3741_p12 = scmp.ne.s32.totalorder %s4391_s8, %s3740_s12  ;;  %p3748_p2 = scmp.lt.s32.totalorder %s3746_s21, %s3740_s12 }
  0x1b   : > { %3547 = vmatprep.mubr.msk.bf16.mxu1 %vm723_vm0, %v3675_v3  ;;  %3484 = vmatmul.mubr.msk.bf16.vlgmr.msra.gmra.mrb[0].mxu0 %vm723_vm0, %v3676_v4  ;;  %v3680_v8 = vld [vmem:[%s3913_s11 + $0x18] sm:$0xff]   ;;  %v3682_v10 = vld [vmem:[%s3913_s11 + $0x20] sm:$0xff]   ;;  %v3684_v12 = vld [vmem:[%s3913_s11 + $0x28] sm:$0xff]  }
  0x1c   : > { %3548 = vmatmul.mubr.msk.bf16.vlgmr.msra.gmra.mrb[0].mxu1 %vm723_vm0, %v3677_v5  ;;  %3487 = vmatprep.mubr.msk.bf16.mxu0 %vm723_vm0, %v3678_v6  ;;  %v3681_v9 = vld [vmem:[%s3913_s11 + $0x118] sm:$0xff]   ;;  %v3683_v11 = vld [vmem:[%s3913_s11 + $0x120] sm:$0xff]   ;;  %v3685_v13 = vld [vmem:[%s3913_s11 + $0x128] sm:$0xff]   ;;  %p3742_p13 = pnand %p3741_p12, %p3888_p4  ;;  %p3749_p3 = por %p3748_p2, %p3747_p1 }
  0x1d   : > { %3551 = vmatprep.mubr.msk.bf16.mxu1 %vm723_vm0, %v3679_v7  ;;  %v3686_v14 = vld [vmem:[%s3913_s11 + $0x30] sm:$0xff]   ;;  %v3688_v16 = vld [vmem:[%s3913_s11 + $0x38] sm:$0xff]   ;;  %v3690_v18 = vld [vmem:[%s3913_s11 + $0x40] sm:$0xff]  }
  0x1e   : > { %v3687_v15 = vld [vmem:[%s3913_s11 + $0x130] sm:$0xff]   ;;  %v3689_v17 = vld [vmem:[%s3913_s11 + $0x138] sm:$0xff]   ;;  %v3691_v19 = vld [vmem:[%s3913_s11 + $0x140] sm:$0xff]   ;;  %p3743_p0 = pneg %p3742_p13 }
  0x1f   : > { %v3692_v20 = vld [vmem:[%s3913_s11 + $0x48] sm:$0xff]   ;;  %v3694_v22 = vld [vmem:[%s3913_s11 + $0x50] sm:$0xff]   ;;  %v3696_v24 = vld [vmem:[%s3913_s11 + $0x58] sm:$0xff]  }
  0x20   : > { %v3693_v21 = vld [vmem:[%s3913_s11 + $0x148] sm:$0xff]   ;;  %v3695_v23 = vld [vmem:[%s3913_s11 + $0x150] sm:$0xff]   ;;  %v3697_v25 = vld [vmem:[%s3913_s11 + $0x158] sm:$0xff]   ;;  %p3750_p5 = pnand %p3749_p3, %p3743_p0 }
  0x21   : > { %v3698_v26 = vld [vmem:[%s3913_s11 + $0x60] sm:$0xff]   ;;  %v3700_v28 = vld [vmem:[%s3913_s11 + $0x68] sm:$0xff]   ;;  %v3702_v30 = vld [vmem:[%s3913_s11 + $0x70] sm:$0xff]  }
  0x22   : > { %v3699_v27 = vld [vmem:[%s3913_s11 + $0x160] sm:$0xff]   ;;  %v3701_v29 = vld [vmem:[%s3913_s11 + $0x168] sm:$0xff]   ;;  %v3703_v31 = vld [vmem:[%s3913_s11 + $0x170] sm:$0xff]  }
  0x23   : > { %3488 = vmatmul.mubr.msk.bf16.gmra.mrb[4].mxu0 %vm723_vm0, %v3680_v8  ;;  %v3704_v32 = vld [vmem:[%s3913_s11 + $0x78] sm:$0xff]   ;;  %v3706_v34 = vld [vmem:[%s3913_s11 + $0x80] sm:$0xff]   ;;  %v3708_v36 = vld [vmem:[%s3913_s11 + $0x88] sm:$0xff]  }
  0x24   : > { %3552 = vmatmul.mubr.msk.bf16.gmra.mrb[4].mxu1 %vm723_vm0, %v3681_v9  ;;  %3491 = vmatprep.mubr.msk.bf16.mxu0 %vm723_vm0, %v3682_v10  ;;  %v3705_v33 = vld [vmem:[%s3913_s11 + $0x178] sm:$0xff]   ;;  %v3707_v35 = vld [vmem:[%s3913_s11 + $0x180] sm:$0xff]   ;;  %v3709_v37 = vld [vmem:[%s3913_s11 + $0x188] sm:$0xff]  }
  0x25   : > { %3555 = vmatprep.mubr.msk.bf16.mxu1 %vm723_vm0, %v3683_v11  ;;  %v3710_v38 = vld [vmem:[%s3913_s11 + $0x90] sm:$0xff]   ;;  %v3712_v40 = vld [vmem:[%s3913_s11 + $0x98] sm:$0xff]   ;;  %v3714_v42 = vld [vmem:[%s3913_s11 + $0xa0] sm:$0xff]  }
  0x26   : > { %v3711_v39 = vld [vmem:[%s3913_s11 + $0x190] sm:$0xff]   ;;  %v3713_v41 = vld [vmem:[%s3913_s11 + $0x198] sm:$0xff]   ;;  %v3715_v43 = vld [vmem:[%s3913_s11 + $0x1a0] sm:$0xff]  }
  0x27   : > { %v3716_v44 = vld [vmem:[%s3913_s11 + $0xa8] sm:$0xff]   ;;  %v3718_v46 = vld [vmem:[%s3913_s11 + $0xb0] sm:$0xff]   ;;  %v3720_v48 = vld [vmem:[%s3913_s11 + $0xb8] sm:$0xff]  }
  0x28   : > { %v3717_v45 = vld [vmem:[%s3913_s11 + $0x1a8] sm:$0xff]   ;;  %v3719_v47 = vld [vmem:[%s3913_s11 + $0x1b0] sm:$0xff]   ;;  %v3721_v49 = vld [vmem:[%s3913_s11 + $0x1b8] sm:$0xff]  }
  0x29   : > { %v3722_v50 = vld [vmem:[%s3913_s11 + $0xc0] sm:$0xff]   ;;  %v3724_v52 = vld [vmem:[%s3913_s11 + $0xc8] sm:$0xff]   ;;  %v3726_v54 = vld [vmem:[%s3913_s11 + $0xd0] sm:$0xff]  }
  0x2a   : > { %v3723_v51 = vld [vmem:[%s3913_s11 + $0x1c0] sm:$0xff]   ;;  %v3725_v53 = vld [vmem:[%s3913_s11 + $0x1c8] sm:$0xff]   ;;  %v3727_v55 = vld [vmem:[%s3913_s11 + $0x1d0] sm:$0xff]  }
  0x2b   : > { %3492 = vmatmul.mubr.msk.bf16.gmra.mrb[8].mxu0 %vm723_vm0, %v3684_v12  ;;  %v3728_v56 = vld [vmem:[%s3913_s11 + $0xd8] sm:$0xff]   ;;  %v3730_v58 = vld [vmem:[%s3913_s11 + $0xe0] sm:$0xff]   ;;  %v3732_v60 = vld [vmem:[%s3913_s11 + $0xe8] sm:$0xff]  }
  0x2c   : > { %3556 = vmatmul.mubr.msk.bf16.gmra.mrb[8].mxu1 %vm723_vm0, %v3685_v13  ;;  %3495 = vmatprep.mubr.msk.bf16.mxu0 %vm723_vm0, %v3686_v14  ;;  %v3729_v57 = vld [vmem:[%s3913_s11 + $0x1d8] sm:$0xff]   ;;  %v3731_v59 = vld [vmem:[%s3913_s11 + $0x1e0] sm:$0xff]   ;;  %v3733_v61 = vld [vmem:[%s3913_s11 + $0x1e8] sm:$0xff]  }
  0x2d   : > { %3559 = vmatprep.mubr.msk.bf16.mxu1 %vm723_vm0, %v3687_v15  ;;  %v3734_v62 = vld [vmem:[%s3913_s11 + $0xf0] sm:$0xff]   ;;  %v3736_v0 = vld [vmem:[%s3913_s11 + $0xf8] sm:$0xff]   ;;  %v4046_v2 = vld [vmem:[%s4447_s2] ss:$0 sm:$0xff] }
  0x2e   : > { %v3735_v63 = vld [vmem:[%s3913_s11 + $0x1f0] sm:$0xff]   ;;  %v3737_v1 = vld [vmem:[%s3913_s11 + $0x1f8] sm:$0xff]   ;;  %v4051_v4 = vld [vmem:[%s4448_s3] ss:$0 sm:$0xff]  ;;  %s4389_s11 = scalar_lea.hbm %s4449_s4, %s3029_s7 }
  0x33   : > { %3496 = vmatmul.mubr.msk.bf16.gmra.mrb[12].mxu0 %vm723_vm0, %v3688_v16 }
  0x34   : > { %3560 = vmatmul.mubr.msk.bf16.gmra.mrb[12].mxu1 %vm723_vm0, %v3689_v17  ;;  %3499 = vmatprep.mubr.msk.bf16.mxu0 %vm723_vm0, %v3690_v18 }
  0x35   : > { %3563 = vmatprep.mubr.msk.bf16.mxu1 %vm723_vm0, %v3691_v19 }
  0x3b   : > { %3500 = vmatmul.mubr.msk.bf16.gmra.mrb[16].mxu0 %vm723_vm0, %v3692_v20 }
  0x3c   : > { %3564 = vmatmul.mubr.msk.bf16.gmra.mrb[16].mxu1 %vm723_vm0, %v3693_v21  ;;  %3503 = vmatprep.mubr.msk.bf16.mxu0 %vm723_vm0, %v3694_v22 }
  0x3d   : > { %3567 = vmatprep.mubr.msk.bf16.mxu1 %vm723_vm0, %v3695_v23 }
  0x43   : > { %3504 = vmatmul.mubr.msk.bf16.gmra.mrb[20].mxu0 %vm723_vm0, %v3696_v24 }
  0x44   : > { %3568 = vmatmul.mubr.msk.bf16.gmra.mrb[20].mxu1 %vm723_vm0, %v3697_v25  ;;  %3507 = vmatprep.mubr.msk.bf16.mxu0 %vm723_vm0, %v3698_v26 }
  0x45   : > { %3571 = vmatprep.mubr.msk.bf16.mxu1 %vm723_vm0, %v3699_v27 }
  0x4b   : > { %3508 = vmatmul.mubr.msk.bf16.gmra.mrb[24].mxu0 %vm723_vm0, %v3700_v28 }
  0x4c   : > { %3572 = vmatmul.mubr.msk.bf16.gmra.mrb[24].mxu1 %vm723_vm0, %v3701_v29  ;;  %3511 = vmatprep.mubr.msk.bf16.mxu0 %vm723_vm0, %v3702_v30 }
  0x4d   : > { %3575 = vmatprep.mubr.msk.bf16.mxu1 %vm723_vm0, %v3703_v31 }
  0x53   : > { %3512 = vmatmul.mubr.msk.bf16.gmra.mrb[28].mxu0 %vm723_vm0, %v3704_v32 }
  0x54   : > { %3576 = vmatmul.mubr.msk.bf16.gmra.mrb[28].mxu1 %vm723_vm0, %v3705_v33  ;;  %3515 = vmatprep.mubr.msk.bf16.mxu0 %vm723_vm0, %v3706_v34 }
  0x55   : > { %3579 = vmatprep.mubr.msk.bf16.mxu1 %vm723_vm0, %v3707_v35 }
  0x5b   : > { %3516 = vmatmul.mubr.msk.bf16.gmra.mrb[32].mxu0 %vm723_vm0, %v3708_v36 }
  0x5c   : > { %3580 = vmatmul.mubr.msk.bf16.gmra.mrb[32].mxu1 %vm723_vm0, %v3709_v37  ;;  %3519 = vmatprep.mubr.msk.bf16.mxu0 %vm723_vm0, %v3710_v38 }
  0x5d   : > { %3583 = vmatprep.mubr.msk.bf16.mxu1 %vm723_vm0, %v3711_v39 }
  0x63   : > { %3520 = vmatmul.mubr.msk.bf16.gmra.mrb[36].mxu0 %vm723_vm0, %v3712_v40 }
  0x64   : > { %3584 = vmatmul.mubr.msk.bf16.gmra.mrb[36].mxu1 %vm723_vm0, %v3713_v41  ;;  %3523 = vmatprep.mubr.msk.bf16.mxu0 %vm723_vm0, %v3714_v42 }
  0x65   : > { %3587 = vmatprep.mubr.msk.bf16.mxu1 %vm723_vm0, %v3715_v43 }
  0x6b   : > { %3524 = vmatmul.mubr.msk.bf16.gmra.mrb[40].mxu0 %vm723_vm0, %v3716_v44 }
  0x6c   : > { %3588 = vmatmul.mubr.msk.bf16.gmra.mrb[40].mxu1 %vm723_vm0, %v3717_v45  ;;  %3527 = vmatprep.mubr.msk.bf16.mxu0 %vm723_vm0, %v3718_v46 }
  0x6d   : > { %3591 = vmatprep.mubr.msk.bf16.mxu1 %vm723_vm0, %v3719_v47 }
  0x73   : > { %3528 = vmatmul.mubr.msk.bf16.gmra.mrb[44].mxu0 %vm723_vm0, %v3720_v48 }
  0x74   : > { %3592 = vmatmul.mubr.msk.bf16.gmra.mrb[44].mxu1 %vm723_vm0, %v3721_v49  ;;  %3531 = vmatprep.mubr.msk.bf16.mxu0 %vm723_vm0, %v3722_v50 }
  0x75   : > { %3595 = vmatprep.mubr.msk.bf16.mxu1 %vm723_vm0, %v3723_v51 }
  0x7b   : > { %3532 = vmatmul.mubr.msk.bf16.gmra.mrb[48].mxu0 %vm723_vm0, %v3724_v52 }
  0x7c   : > { %3596 = vmatmul.mubr.msk.bf16.gmra.mrb[48].mxu1 %vm723_vm0, %v3725_v53  ;;  %3535 = vmatprep.mubr.msk.bf16.mxu0 %vm723_vm0, %v3726_v54 }
  0x7d   : > { %3599 = vmatprep.mubr.msk.bf16.mxu1 %vm723_vm0, %v3727_v55 }
  0x83   : > { %3536 = vmatmul.mubr.msk.bf16.gmra.mrb[52].mxu0 %vm723_vm0, %v3728_v56 }
  0x84   : > { %3600 = vmatmul.mubr.msk.bf16.gmra.mrb[52].mxu1 %vm723_vm0, %v3729_v57  ;;  %3539 = vmatprep.mubr.msk.bf16.mxu0 %vm723_vm0, %v3730_v58 }
  0x85   : > { %3603 = vmatprep.mubr.msk.bf16.mxu1 %vm723_vm0, %v3731_v59 }
  0x8b   : > { %3540 = vmatmul.mubr.msk.bf16.gmra.mrb[56].mxu0 %vm723_vm0, %v3732_v60 }
  0x8c   : > { %3604 = vmatmul.mubr.msk.bf16.gmra.mrb[56].mxu1 %vm723_vm0, %v3733_v61  ;;  %3543 = vmatprep.mubr.msk.bf16.mxu0 %vm723_vm0, %v3734_v62 }
  0x8d   : > { %3607 = vmatprep.mubr.msk.bf16.mxu1 %vm723_vm0, %v3735_v63 }
  0x93   : > { %3544 = vmatmul.mubr.msk.bf16.gmra.mrb[60].mxu0 %vm723_vm0, %v3736_v0 }
  0x94   : > { %3608 = vmatmul.mubr.msk.bf16.gmra.mrb[60].mxu1 %vm723_vm0, %v3737_v1 }
  0xee   : > { %v3485_v3 = vpop.f32.mrb[0].mxu0 }
  0xef   : > { %v1470_v5 = vmul.f32 %v3485_v3, %v4046_v2  ;;  %v3549_v6 = vpop.f32.mrb[0].mxu1  ;;  %v950_v7 = vpop.f32.mrb[1].mxu0 }
  0xf0   : > { %v1534_v8 = vmul.f32 %v3549_v6, %v4046_v2  ;;  %v1468_v9 = vmul.f32 %v4046_v2, %v950_v7  ;;  %v1206_v10 = vpop.f32.mrb[1].mxu1  ;;  %v3486_v11 = vpop.f32.mrb[2].mxu0 }
  0xf1   : > { %v1605_v12 = vadd.f32 %v4051_v4, %v1470_v5  ;;  %v1532_v13 = vmul.f32 %v4046_v2, %v1206_v10  ;;  %v1471_v14 = vmul.f32 %v3486_v11, %v4046_v2  ;;  %v3550_v15 = vpop.f32.mrb[2].mxu1  ;;  %v953_v16 = vpop.f32.mrb[3].mxu0 }
  0xf2   : > { %v1669_v17 = vadd.f32 %v4051_v4, %v1534_v8  ;;  %v1603_v18 = vadd.f32 %v4051_v4, %v1468_v9  ;;  %v1535_v19 = vmul.f32 %v3550_v15, %v4046_v2  ;;  %v1469_v20 = vmul.f32 %v4046_v2, %v953_v16  ;;  %v1209_v21 = vpop.f32.mrb[3].mxu1 }
  0xf3   : > { %v1667_v22 = vadd.f32 %v4051_v4, %v1532_v13  ;;  %v1606_v23 = vadd.f32 %v4051_v4, %v1471_v14  ;;  %v1533_v24 = vmul.f32 %v4046_v2, %v1209_v21  ;;  %v1733_v27 = vmax.f32 %v1605_v12, 0.0 }
  0xf4   : > { %v1670_v25 = vadd.f32 %v4051_v4, %v1535_v19  ;;  %v1604_v26 = vadd.f32 %v4051_v4, %v1469_v20  ;;  %v1797_v30 = vmax.f32 %v1669_v17, 0.0  ;;  %v1731_v31 = vmax.f32 %v1603_v18, 0.0 }
  0xf5   : > { %v1734_v28 = vmax.f32 %v1606_v23, 0.0  ;;  %v1668_v29 = vadd.f32 %v4051_v4, %v1533_v24  ;;  %v1795_v35 = vmax.f32 %v1667_v22, 0.0 }
  0xf6   : > { %v1798_v32 = vmax.f32 %v1670_v25, 0.0  ;;  %v1732_v33 = vmax.f32 %v1604_v26, 0.0  ;;  %v3489_v34 = vpop.f32.mrb[4].mxu0 }
  0xf7   : > { %v3038_v36 = vpack.c.bf16 %v1734_v28, %v1733_v27  ;;  %v1796_v37 = vmax.f32 %v1668_v29, 0.0  ;;  %v1474_v38 = vmul.f32 %v3489_v34, %v4046_v2  ;;  %v3553_v39 = vpop.f32.mrb[4].mxu1  ;;  %v966_v40 = vpop.f32.mrb[5].mxu0 }
  0xf8   : > { %v3198_v41 = vpack.c.bf16 %v1798_v32, %v1797_v30  ;;  %v3033_v42 = vpack.c.bf16 %v1732_v33, %v1731_v31  ;;  %v1538_v43 = vmul.f32 %v3553_v39, %v4046_v2  ;;  %v1472_v44 = vmul.f32 %v4046_v2, %v966_v40  ;;  %v1222_v45 = vpop.f32.mrb[5].mxu1  ;;  %v3490_v46 = vpop.f32.mrb[6].mxu0 }
  0xf9   : > { %3350 = vst [vmem:[%s4075_s26 + $0x8] sm:$0xff] %v3038_v36   ;;  %v3193_v47 = vpack.c.bf16 %v1796_v37, %v1795_v35  ;;  %v1609_v48 = vadd.f32 %v4051_v4, %v1474_v38  ;;  %v1536_v49 = vmul.f32 %v4046_v2, %v1222_v45  ;;  %v1475_v50 = vmul.f32 %v3490_v46, %v4046_v2  ;;  %v3554_v51 = vpop.f32.mrb[6].mxu1  ;;  %v969_v52 = vpop.f32.mrb[7].mxu0 }
  0xfa   : > { %3382 = vst [vmem:[%s4075_s26 + $0x108] sm:$0xff] %v3198_v41   ;;  %3034 = vst [vmem:[%s4075_s26] sm:$0xff] %v3033_v42   ;;  %v1673_v53 = vadd.f32 %v4051_v4, %v1538_v43  ;;  %v1607_v54 = vadd.f32 %v4051_v4, %v1472_v44  ;;  %v1539_v55 = vmul.f32 %v3554_v51, %v4046_v2  ;;  %v1225_v57 = vpop.f32.mrb[7].mxu1 }
  0xfb   : > { %v1473_v56 = vmul.f32 %v4046_v2, %v969_v52  ;;  %3381 = vst [vmem:[%s4075_s26 + $0x100] sm:$0xff] %v3193_v47   ;;  %v1671_v58 = vadd.f32 %v4051_v4, %v1536_v49  ;;  %v1610_v59 = vadd.f32 %v4051_v4, %v1475_v50  ;;  %v1537_v60 = vmul.f32 %v4046_v2, %v1225_v57 }
  0xfc   : > { %v1674_v61 = vadd.f32 %v4051_v4, %v1539_v55  ;;  %v1737_v63 = vmax.f32 %v1609_v48, 0.0  ;;  %v1801_v3 = vmax.f32 %v1673_v53, 0.0  ;;  %v1735_v5 = vmax.f32 %v1607_v54, 0.0 }
  0xfd   : > { %v1608_v62 = vadd.f32 %v4051_v4, %v1473_v56  ;;  %v1738_v0 = vmax.f32 %v1610_v59, 0.0  ;;  %v1672_v1 = vadd.f32 %v4051_v4, %v1537_v60  ;;  %v1799_v9 = vmax.f32 %v1671_v58, 0.0 }
  0xfe   : > { %v1802_v6 = vmax.f32 %v1674_v61, 0.0  ;;  %v3493_v8 = vpop.f32.mrb[8].mxu0 }
  0xff   : > { %v1736_v7 = vmax.f32 %v1608_v62, 0.0  ;;  %v3048_v10 = vpack.c.bf16 %v1738_v0, %v1737_v63  ;;  %v1800_v11 = vmax.f32 %v1672_v1, 0.0  ;;  %v1478_v12 = vmul.f32 %v3493_v8, %v4046_v2  ;;  %v3557_v13 = vpop.f32.mrb[8].mxu1  ;;  %v982_v14 = vpop.f32.mrb[9].mxu0 }
 0x100   : > { %v3208_v15 = vpack.c.bf16 %v1802_v6, %v1801_v3  ;;  %v1542_v17 = vmul.f32 %v3557_v13, %v4046_v2  ;;  %v1476_v18 = vmul.f32 %v4046_v2, %v982_v14  ;;  %v1238_v19 = vpop.f32.mrb[9].mxu1  ;;  %v3494_v20 = vpop.f32.mrb[10].mxu0 }
 0x101   : > { %v3043_v16 = vpack.c.bf16 %v1736_v7, %v1735_v5  ;;  %3352 = vst [vmem:[%s4075_s26 + $0x18] sm:$0xff] %v3048_v10   ;;  %v3203_v21 = vpack.c.bf16 %v1800_v11, %v1799_v9  ;;  %v1613_v22 = vadd.f32 %v4051_v4, %v1478_v12  ;;  %v1540_v23 = vmul.f32 %v4046_v2, %v1238_v19  ;;  %v3558_v25 = vpop.f32.mrb[10].mxu1  ;;  %v985_v26 = vpop.f32.mrb[11].mxu0 }
 0x102   : > { %v1479_v24 = vmul.f32 %v3494_v20, %v4046_v2  ;;  %3384 = vst [vmem:[%s4075_s26 + $0x118] sm:$0xff] %v3208_v15   ;;  %v1677_v27 = vadd.f32 %v4051_v4, %v1542_v17  ;;  %v1611_v28 = vadd.f32 %v4051_v4, %v1476_v18  ;;  %v1543_v29 = vmul.f32 %v3558_v25, %v4046_v2  ;;  %v1241_v31 = vpop.f32.mrb[11].mxu1 }
 0x103   : > { %3351 = vst [vmem:[%s4075_s26 + $0x10] sm:$0xff] %v3043_v16   ;;  %v1477_v30 = vmul.f32 %v4046_v2, %v985_v26  ;;  %3383 = vst [vmem:[%s4075_s26 + $0x110] sm:$0xff] %v3203_v21   ;;  %v1675_v32 = vadd.f32 %v4051_v4, %v1540_v23  ;;  %v1541_v34 = vmul.f32 %v4046_v2, %v1241_v31  ;;  %v1741_v37 = vmax.f32 %v1613_v22, 0.0 }
 0x104   : > { %v1614_v33 = vadd.f32 %v4051_v4, %v1479_v24  ;;  %v1678_v35 = vadd.f32 %v4051_v4, %v1543_v29  ;;  %v1805_v40 = vmax.f32 %v1677_v27, 0.0  ;;  %v1739_v41 = vmax.f32 %v1611_v28, 0.0 }
 0x105   : > { %v1612_v36 = vadd.f32 %v4051_v4, %v1477_v30  ;;  %v1676_v39 = vadd.f32 %v4051_v4, %v1541_v34  ;;  %v1803_v45 = vmax.f32 %v1675_v32, 0.0 }
 0x106   : > { %v1742_v38 = vmax.f32 %v1614_v33, 0.0  ;;  %v1806_v42 = vmax.f32 %v1678_v35, 0.0  ;;  %v3497_v44 = vpop.f32.mrb[12].mxu0 }
 0x107   : > { %v1740_v43 = vmax.f32 %v1612_v36, 0.0  ;;  %v1804_v47 = vmax.f32 %v1676_v39, 0.0  ;;  %v1482_v48 = vmul.f32 %v3497_v44, %v4046_v2  ;;  %v3561_v49 = vpop.f32.mrb[12].mxu1  ;;  %v998_v50 = vpop.f32.mrb[13].mxu0 }
 0x108   : > { %v3058_v46 = vpack.c.bf16 %v1742_v38, %v1741_v37  ;;  %v3218_v51 = vpack.c.bf16 %v1806_v42, %v1805_v40  ;;  %v1546_v53 = vmul.f32 %v3561_v49, %v4046_v2  ;;  %v1480_v54 = vmul.f32 %v4046_v2, %v998_v50  ;;  %v1254_v55 = vpop.f32.mrb[13].mxu1  ;;  %v3498_v56 = vpop.f32.mrb[14].mxu0 }
 0x109   : > { %v3053_v52 = vpack.c.bf16 %v1740_v43, %v1739_v41  ;;  %v3213_v57 = vpack.c.bf16 %v1804_v47, %v1803_v45  ;;  %v1617_v58 = vadd.f32 %v4051_v4, %v1482_v48  ;;  %v1544_v59 = vmul.f32 %v4046_v2, %v1254_v55  ;;  %v3562_v61 = vpop.f32.mrb[14].mxu1  ;;  %v1001_v62 = vpop.f32.mrb[15].mxu0 }
 0x10a   : > { %3354 = vst [vmem:[%s4075_s26 + $0x28] sm:$0xff] %v3058_v46   ;;  %v1483_v60 = vmul.f32 %v3498_v56, %v4046_v2  ;;  %3386 = vst [vmem:[%s4075_s26 + $0x128] sm:$0xff] %v3218_v51   ;;  %v1681_v63 = vadd.f32 %v4051_v4, %v1546_v53  ;;  %v1615_v0 = vadd.f32 %v4051_v4, %v1480_v54  ;;  %v1257_v5 = vpop.f32.mrb[15].mxu1 }
 0x10b   : > { %3353 = vst [vmem:[%s4075_s26 + $0x20] sm:$0xff] %v3053_v52   ;;  %v1547_v1 = vmul.f32 %v3562_v61, %v4046_v2  ;;  %v1481_v3 = vmul.f32 %v4046_v2, %v1001_v62  ;;  %3385 = vst [vmem:[%s4075_s26 + $0x120] sm:$0xff] %v3213_v57   ;;  %v1679_v6 = vadd.f32 %v4051_v4, %v1544_v59  ;;  %v1745_v11 = vmax.f32 %v1617_v58, 0.0 }
 0x10c   : > { %v1618_v7 = vadd.f32 %v4051_v4, %v1483_v60  ;;  %v1545_v8 = vmul.f32 %v4046_v2, %v1257_v5  ;;  %v1809_v14 = vmax.f32 %v1681_v63, 0.0  ;;  %v1743_v15 = vmax.f32 %v1615_v0, 0.0 }
 0x10d   : > { %v1682_v9 = vadd.f32 %v4051_v4, %v1547_v1  ;;  %v1616_v10 = vadd.f32 %v4051_v4, %v1481_v3  ;;  %v1807_v19 = vmax.f32 %v1679_v6, 0.0 }
 0x10e   : > { %v1746_v12 = vmax.f32 %v1618_v7, 0.0  ;;  %v1680_v13 = vadd.f32 %v4051_v4, %v1545_v8  ;;  %v3501_v18 = vpop.f32.mrb[16].mxu0 }
 0x10f   : > { %v1810_v16 = vmax.f32 %v1682_v9, 0.0  ;;  %v1744_v17 = vmax.f32 %v1616_v10, 0.0  ;;  %v1486_v22 = vmul.f32 %v3501_v18, %v4046_v2  ;;  %v3565_v23 = vpop.f32.mrb[16].mxu1  ;;  %v1014_v24 = vpop.f32.mrb[17].mxu0 }
 0x110   : > { %v3068_v20 = vpack.c.bf16 %v1746_v12, %v1745_v11  ;;  %v1808_v21 = vmax.f32 %v1680_v13, 0.0  ;;  %v1550_v27 = vmul.f32 %v3565_v23, %v4046_v2  ;;  %v1484_v28 = vmul.f32 %v4046_v2, %v1014_v24  ;;  %v1270_v29 = vpop.f32.mrb[17].mxu1  ;;  %v3502_v30 = vpop.f32.mrb[18].mxu0 }
 0x111   : > { %v3228_v25 = vpack.c.bf16 %v1810_v16, %v1809_v14  ;;  %v3063_v26 = vpack.c.bf16 %v1744_v17, %v1743_v15  ;;  %v1621_v32 = vadd.f32 %v4051_v4, %v1486_v22  ;;  %v1548_v33 = vmul.f32 %v4046_v2, %v1270_v29  ;;  %v3566_v35 = vpop.f32.mrb[18].mxu1  ;;  %v1017_v36 = vpop.f32.mrb[19].mxu0 }
 0x112   : > { %3356 = vst [vmem:[%s4075_s26 + $0x38] sm:$0xff] %v3068_v20   ;;  %v3223_v31 = vpack.c.bf16 %v1808_v21, %v1807_v19  ;;  %v1487_v34 = vmul.f32 %v3502_v30, %v4046_v2  ;;  %v1685_v37 = vadd.f32 %v4051_v4, %v1550_v27  ;;  %v1619_v38 = vadd.f32 %v4051_v4, %v1484_v28  ;;  %v1273_v41 = vpop.f32.mrb[19].mxu1 }
 0x113   : > { %3388 = vst [vmem:[%s4075_s26 + $0x138] sm:$0xff] %v3228_v25   ;;  %3355 = vst [vmem:[%s4075_s26 + $0x30] sm:$0xff] %v3063_v26   ;;  %v1551_v39 = vmul.f32 %v3566_v35, %v4046_v2  ;;  %v1485_v40 = vmul.f32 %v4046_v2, %v1017_v36  ;;  %v1683_v42 = vadd.f32 %v4051_v4, %v1548_v33  ;;  %v1749_v47 = vmax.f32 %v1621_v32, 0.0 }
 0x114   : > { %3387 = vst [vmem:[%s4075_s26 + $0x130] sm:$0xff] %v3223_v31   ;;  %v1622_v43 = vadd.f32 %v4051_v4, %v1487_v34  ;;  %v1549_v44 = vmul.f32 %v4046_v2, %v1273_v41  ;;  %v1813_v50 = vmax.f32 %v1685_v37, 0.0  ;;  %v1747_v51 = vmax.f32 %v1619_v38, 0.0 }
 0x115   : > { %v1686_v45 = vadd.f32 %v4051_v4, %v1551_v39  ;;  %v1620_v46 = vadd.f32 %v4051_v4, %v1485_v40  ;;  %v1811_v55 = vmax.f32 %v1683_v42, 0.0 }
 0x116   : > { %v1750_v48 = vmax.f32 %v1622_v43, 0.0  ;;  %v1684_v49 = vadd.f32 %v4051_v4, %v1549_v44  ;;  %v3505_v54 = vpop.f32.mrb[20].mxu0 }
 0x117   : > { %v1814_v52 = vmax.f32 %v1686_v45, 0.0  ;;  %v1748_v53 = vmax.f32 %v1620_v46, 0.0  ;;  %v1490_v58 = vmul.f32 %v3505_v54, %v4046_v2  ;;  %v3569_v59 = vpop.f32.mrb[20].mxu1  ;;  %v1030_v60 = vpop.f32.mrb[21].mxu0 }
 0x118   : > { %v3078_v56 = vpack.c.bf16 %v1750_v48, %v1749_v47  ;;  %v1812_v57 = vmax.f32 %v1684_v49, 0.0  ;;  %v1554_v63 = vmul.f32 %v3569_v59, %v4046_v2  ;;  %v1488_v0 = vmul.f32 %v4046_v2, %v1030_v60  ;;  %v1286_v1 = vpop.f32.mrb[21].mxu1  ;;  %v3506_v3 = vpop.f32.mrb[22].mxu0 }
 0x119   : > { %v3238_v61 = vpack.c.bf16 %v1814_v52, %v1813_v50  ;;  %v3073_v62 = vpack.c.bf16 %v1748_v53, %v1747_v51  ;;  %v1625_v6 = vadd.f32 %v4051_v4, %v1490_v58  ;;  %v1552_v7 = vmul.f32 %v4046_v2, %v1286_v1  ;;  %v3570_v9 = vpop.f32.mrb[22].mxu1  ;;  %v1033_v10 = vpop.f32.mrb[23].mxu0 }
 0x11a   : > { %3358 = vst [vmem:[%s4075_s26 + $0x48] sm:$0xff] %v3078_v56   ;;  %v3233_v5 = vpack.c.bf16 %v1812_v57, %v1811_v55  ;;  %v1491_v8 = vmul.f32 %v3506_v3, %v4046_v2  ;;  %v1689_v11 = vadd.f32 %v4051_v4, %v1554_v63  ;;  %v1623_v12 = vadd.f32 %v4051_v4, %v1488_v0  ;;  %v1289_v15 = vpop.f32.mrb[23].mxu1 }
 0x11b   : > { %3390 = vst [vmem:[%s4075_s26 + $0x148] sm:$0xff] %v3238_v61   ;;  %3357 = vst [vmem:[%s4075_s26 + $0x40] sm:$0xff] %v3073_v62   ;;  %v1555_v13 = vmul.f32 %v3570_v9, %v4046_v2  ;;  %v1489_v14 = vmul.f32 %v4046_v2, %v1033_v10  ;;  %v1687_v16 = vadd.f32 %v4051_v4, %v1552_v7  ;;  %v1753_v21 = vmax.f32 %v1625_v6, 0.0 }
 0x11c   : > { %3389 = vst [vmem:[%s4075_s26 + $0x140] sm:$0xff] %v3233_v5   ;;  %v1626_v17 = vadd.f32 %v4051_v4, %v1491_v8  ;;  %v1553_v18 = vmul.f32 %v4046_v2, %v1289_v15  ;;  %v1817_v24 = vmax.f32 %v1689_v11, 0.0  ;;  %v1751_v25 = vmax.f32 %v1623_v12, 0.0 }
 0x11d   : > { %v1690_v19 = vadd.f32 %v4051_v4, %v1555_v13  ;;  %v1624_v20 = vadd.f32 %v4051_v4, %v1489_v14  ;;  %v1815_v29 = vmax.f32 %v1687_v16, 0.0 }
 0x11e   : > { %v1754_v22 = vmax.f32 %v1626_v17, 0.0  ;;  %v1688_v23 = vadd.f32 %v4051_v4, %v1553_v18  ;;  %v3509_v28 = vpop.f32.mrb[24].mxu0 }
 0x11f   : > { %v1818_v26 = vmax.f32 %v1690_v19, 0.0  ;;  %v1752_v27 = vmax.f32 %v1624_v20, 0.0  ;;  %v1494_v32 = vmul.f32 %v3509_v28, %v4046_v2  ;;  %v3573_v33 = vpop.f32.mrb[24].mxu1  ;;  %v1046_v34 = vpop.f32.mrb[25].mxu0 }
 0x120   : > { %v3088_v30 = vpack.c.bf16 %v1754_v22, %v1753_v21  ;;  %v1816_v31 = vmax.f32 %v1688_v23, 0.0  ;;  %v1558_v37 = vmul.f32 %v3573_v33, %v4046_v2  ;;  %v1492_v38 = vmul.f32 %v4046_v2, %v1046_v34  ;;  %v1302_v39 = vpop.f32.mrb[25].mxu1  ;;  %v3510_v40 = vpop.f32.mrb[26].mxu0 }
 0x121   : > { %v3248_v35 = vpack.c.bf16 %v1818_v26, %v1817_v24  ;;  %v3083_v36 = vpack.c.bf16 %v1752_v27, %v1751_v25  ;;  %v1629_v42 = vadd.f32 %v4051_v4, %v1494_v32  ;;  %v1556_v43 = vmul.f32 %v4046_v2, %v1302_v39  ;;  %v3574_v45 = vpop.f32.mrb[26].mxu1  ;;  %v1049_v46 = vpop.f32.mrb[27].mxu0 }
 0x122   : > { %3360 = vst [vmem:[%s4075_s26 + $0x58] sm:$0xff] %v3088_v30   ;;  %v3243_v41 = vpack.c.bf16 %v1816_v31, %v1815_v29  ;;  %v1495_v44 = vmul.f32 %v3510_v40, %v4046_v2  ;;  %v1693_v47 = vadd.f32 %v4051_v4, %v1558_v37  ;;  %v1627_v48 = vadd.f32 %v4051_v4, %v1492_v38  ;;  %v1305_v51 = vpop.f32.mrb[27].mxu1 }
 0x123   : > { %3392 = vst [vmem:[%s4075_s26 + $0x158] sm:$0xff] %v3248_v35   ;;  %3359 = vst [vmem:[%s4075_s26 + $0x50] sm:$0xff] %v3083_v36   ;;  %v1559_v49 = vmul.f32 %v3574_v45, %v4046_v2  ;;  %v1493_v50 = vmul.f32 %v4046_v2, %v1049_v46  ;;  %v1691_v52 = vadd.f32 %v4051_v4, %v1556_v43  ;;  %v1757_v57 = vmax.f32 %v1629_v42, 0.0 }
 0x124   : > { %3391 = vst [vmem:[%s4075_s26 + $0x150] sm:$0xff] %v3243_v41   ;;  %v1630_v53 = vadd.f32 %v4051_v4, %v1495_v44  ;;  %v1557_v54 = vmul.f32 %v4046_v2, %v1305_v51  ;;  %v1821_v60 = vmax.f32 %v1693_v47, 0.0  ;;  %v1755_v61 = vmax.f32 %v1627_v48, 0.0 }
 0x125   : > { %v1694_v55 = vadd.f32 %v4051_v4, %v1559_v49  ;;  %v1628_v56 = vadd.f32 %v4051_v4, %v1493_v50  ;;  %v1819_v1 = vmax.f32 %v1691_v52, 0.0 }
 0x126   : > { %v1758_v58 = vmax.f32 %v1630_v53, 0.0  ;;  %v1692_v59 = vadd.f32 %v4051_v4, %v1557_v54  ;;  %v3513_v0 = vpop.f32.mrb[28].mxu0 }
 0x127   : > { %v1822_v62 = vmax.f32 %v1694_v55, 0.0  ;;  %v1756_v63 = vmax.f32 %v1628_v56, 0.0  ;;  %v1498_v6 = vmul.f32 %v3513_v0, %v4046_v2  ;;  %v3577_v7 = vpop.f32.mrb[28].mxu1  ;;  %v1062_v8 = vpop.f32.mrb[29].mxu0 }
 0x128   : > { %v3098_v3 = vpack.c.bf16 %v1758_v58, %v1757_v57  ;;  %v1820_v5 = vmax.f32 %v1692_v59, 0.0  ;;  %v1562_v11 = vmul.f32 %v3577_v7, %v4046_v2  ;;  %v1496_v12 = vmul.f32 %v4046_v2, %v1062_v8  ;;  %v1318_v13 = vpop.f32.mrb[29].mxu1  ;;  %v3514_v14 = vpop.f32.mrb[30].mxu0 }
 0x129   : > { %v3258_v9 = vpack.c.bf16 %v1822_v62, %v1821_v60  ;;  %v3093_v10 = vpack.c.bf16 %v1756_v63, %v1755_v61  ;;  %v1633_v16 = vadd.f32 %v4051_v4, %v1498_v6  ;;  %v1560_v17 = vmul.f32 %v4046_v2, %v1318_v13  ;;  %v3578_v19 = vpop.f32.mrb[30].mxu1  ;;  %v1065_v20 = vpop.f32.mrb[31].mxu0 }
 0x12a   : > { %3362 = vst [vmem:[%s4075_s26 + $0x68] sm:$0xff] %v3098_v3   ;;  %v3253_v15 = vpack.c.bf16 %v1820_v5, %v1819_v1  ;;  %v1499_v18 = vmul.f32 %v3514_v14, %v4046_v2  ;;  %v1697_v21 = vadd.f32 %v4051_v4, %v1562_v11  ;;  %v1631_v22 = vadd.f32 %v4051_v4, %v1496_v12  ;;  %v1321_v25 = vpop.f32.mrb[31].mxu1 }
 0x12b   : > { %3394 = vst [vmem:[%s4075_s26 + $0x168] sm:$0xff] %v3258_v9   ;;  %3361 = vst [vmem:[%s4075_s26 + $0x60] sm:$0xff] %v3093_v10   ;;  %v1563_v23 = vmul.f32 %v3578_v19, %v4046_v2  ;;  %v1497_v24 = vmul.f32 %v4046_v2, %v1065_v20  ;;  %v1695_v26 = vadd.f32 %v4051_v4, %v1560_v17  ;;  %v1761_v31 = vmax.f32 %v1633_v16, 0.0 }
 0x12c   : > { %3393 = vst [vmem:[%s4075_s26 + $0x160] sm:$0xff] %v3253_v15   ;;  %v1634_v27 = vadd.f32 %v4051_v4, %v1499_v18  ;;  %v1561_v28 = vmul.f32 %v4046_v2, %v1321_v25  ;;  %v1825_v34 = vmax.f32 %v1697_v21, 0.0  ;;  %v1759_v35 = vmax.f32 %v1631_v22, 0.0 }
 0x12d   : > { %v1698_v29 = vadd.f32 %v4051_v4, %v1563_v23  ;;  %v1632_v30 = vadd.f32 %v4051_v4, %v1497_v24  ;;  %v1823_v39 = vmax.f32 %v1695_v26, 0.0 }
 0x12e   : > { %v1762_v32 = vmax.f32 %v1634_v27, 0.0  ;;  %v1696_v33 = vadd.f32 %v4051_v4, %v1561_v28  ;;  %v3517_v38 = vpop.f32.mrb[32].mxu0 }
 0x12f   : > { %v1826_v36 = vmax.f32 %v1698_v29, 0.0  ;;  %v1760_v37 = vmax.f32 %v1632_v30, 0.0  ;;  %v1502_v42 = vmul.f32 %v3517_v38, %v4046_v2  ;;  %v3581_v43 = vpop.f32.mrb[32].mxu1  ;;  %v1078_v44 = vpop.f32.mrb[33].mxu0 }
 0x130   : > { %v3108_v40 = vpack.c.bf16 %v1762_v32, %v1761_v31  ;;  %v1824_v41 = vmax.f32 %v1696_v33, 0.0  ;;  %v1566_v47 = vmul.f32 %v3581_v43, %v4046_v2  ;;  %v1500_v48 = vmul.f32 %v4046_v2, %v1078_v44  ;;  %v1334_v49 = vpop.f32.mrb[33].mxu1  ;;  %v3518_v50 = vpop.f32.mrb[34].mxu0 }
 0x131   : > { %v3268_v45 = vpack.c.bf16 %v1826_v36, %v1825_v34  ;;  %v3103_v46 = vpack.c.bf16 %v1760_v37, %v1759_v35  ;;  %v1637_v52 = vadd.f32 %v4051_v4, %v1502_v42  ;;  %v1564_v53 = vmul.f32 %v4046_v2, %v1334_v49  ;;  %v3582_v55 = vpop.f32.mrb[34].mxu1  ;;  %v1081_v56 = vpop.f32.mrb[35].mxu0 }
 0x132   : > { %3364 = vst [vmem:[%s4075_s26 + $0x78] sm:$0xff] %v3108_v40   ;;  %v3263_v51 = vpack.c.bf16 %v1824_v41, %v1823_v39  ;;  %v1503_v54 = vmul.f32 %v3518_v50, %v4046_v2  ;;  %v1701_v57 = vadd.f32 %v4051_v4, %v1566_v47  ;;  %v1635_v58 = vadd.f32 %v4051_v4, %v1500_v48  ;;  %v1337_v61 = vpop.f32.mrb[35].mxu1 }
 0x133   : > { %3396 = vst [vmem:[%s4075_s26 + $0x178] sm:$0xff] %v3268_v45   ;;  %3363 = vst [vmem:[%s4075_s26 + $0x70] sm:$0xff] %v3103_v46   ;;  %v1567_v59 = vmul.f32 %v3582_v55, %v4046_v2  ;;  %v1501_v60 = vmul.f32 %v4046_v2, %v1081_v56  ;;  %v1699_v62 = vadd.f32 %v4051_v4, %v1564_v53  ;;  %v1765_v5 = vmax.f32 %v1637_v52, 0.0 }
 0x134   : > { %3395 = vst [vmem:[%s4075_s26 + $0x170] sm:$0xff] %v3263_v51   ;;  %v1638_v63 = vadd.f32 %v4051_v4, %v1503_v54  ;;  %v1565_v0 = vmul.f32 %v4046_v2, %v1337_v61  ;;  %v1829_v8 = vmax.f32 %v1701_v57, 0.0  ;;  %v1763_v9 = vmax.f32 %v1635_v58, 0.0 }
 0x135   : > { %v1702_v1 = vadd.f32 %v4051_v4, %v1567_v59  ;;  %v1636_v3 = vadd.f32 %v4051_v4, %v1501_v60  ;;  %v1827_v13 = vmax.f32 %v1699_v62, 0.0 }
 0x136   : > { %v1766_v6 = vmax.f32 %v1638_v63, 0.0  ;;  %v1700_v7 = vadd.f32 %v4051_v4, %v1565_v0  ;;  %v3521_v12 = vpop.f32.mrb[36].mxu0 }
 0x137   : > { %v1830_v10 = vmax.f32 %v1702_v1, 0.0  ;;  %v1764_v11 = vmax.f32 %v1636_v3, 0.0  ;;  %v1506_v16 = vmul.f32 %v3521_v12, %v4046_v2  ;;  %v3585_v17 = vpop.f32.mrb[36].mxu1  ;;  %v1094_v18 = vpop.f32.mrb[37].mxu0 }
 0x138   : > { %v3118_v14 = vpack.c.bf16 %v1766_v6, %v1765_v5  ;;  %v1828_v15 = vmax.f32 %v1700_v7, 0.0  ;;  %v1570_v21 = vmul.f32 %v3585_v17, %v4046_v2  ;;  %v1504_v22 = vmul.f32 %v4046_v2, %v1094_v18  ;;  %v1350_v23 = vpop.f32.mrb[37].mxu1  ;;  %v3522_v24 = vpop.f32.mrb[38].mxu0 }
 0x139   : > { %v3278_v19 = vpack.c.bf16 %v1830_v10, %v1829_v8  ;;  %v3113_v20 = vpack.c.bf16 %v1764_v11, %v1763_v9  ;;  %v1641_v26 = vadd.f32 %v4051_v4, %v1506_v16  ;;  %v1568_v27 = vmul.f32 %v4046_v2, %v1350_v23  ;;  %v3586_v29 = vpop.f32.mrb[38].mxu1  ;;  %v1097_v30 = vpop.f32.mrb[39].mxu0 }
 0x13a   : > { %3366 = vst [vmem:[%s4075_s26 + $0x88] sm:$0xff] %v3118_v14   ;;  %v3273_v25 = vpack.c.bf16 %v1828_v15, %v1827_v13  ;;  %v1507_v28 = vmul.f32 %v3522_v24, %v4046_v2  ;;  %v1705_v31 = vadd.f32 %v4051_v4, %v1570_v21  ;;  %v1639_v32 = vadd.f32 %v4051_v4, %v1504_v22  ;;  %v1353_v35 = vpop.f32.mrb[39].mxu1 }
 0x13b   : > { %3398 = vst [vmem:[%s4075_s26 + $0x188] sm:$0xff] %v3278_v19   ;;  %3365 = vst [vmem:[%s4075_s26 + $0x80] sm:$0xff] %v3113_v20   ;;  %v1571_v33 = vmul.f32 %v3586_v29, %v4046_v2  ;;  %v1505_v34 = vmul.f32 %v4046_v2, %v1097_v30  ;;  %v1703_v36 = vadd.f32 %v4051_v4, %v1568_v27  ;;  %v1769_v41 = vmax.f32 %v1641_v26, 0.0 }
 0x13c   : > { %3397 = vst [vmem:[%s4075_s26 + $0x180] sm:$0xff] %v3273_v25   ;;  %v1642_v37 = vadd.f32 %v4051_v4, %v1507_v28  ;;  %v1569_v38 = vmul.f32 %v4046_v2, %v1353_v35  ;;  %v1833_v44 = vmax.f32 %v1705_v31, 0.0  ;;  %v1767_v45 = vmax.f32 %v1639_v32, 0.0 }
 0x13d   : > { %v1706_v39 = vadd.f32 %v4051_v4, %v1571_v33  ;;  %v1640_v40 = vadd.f32 %v4051_v4, %v1505_v34  ;;  %v1831_v49 = vmax.f32 %v1703_v36, 0.0 }
 0x13e   : > { %v1770_v42 = vmax.f32 %v1642_v37, 0.0  ;;  %v1704_v43 = vadd.f32 %v4051_v4, %v1569_v38  ;;  %v3525_v48 = vpop.f32.mrb[40].mxu0 }
 0x13f   : > { %v1834_v46 = vmax.f32 %v1706_v39, 0.0  ;;  %v1768_v47 = vmax.f32 %v1640_v40, 0.0  ;;  %v1510_v52 = vmul.f32 %v3525_v48, %v4046_v2  ;;  %v3589_v53 = vpop.f32.mrb[40].mxu1  ;;  %v1110_v54 = vpop.f32.mrb[41].mxu0 }
 0x140   : > { %v3128_v50 = vpack.c.bf16 %v1770_v42, %v1769_v41  ;;  %v1832_v51 = vmax.f32 %v1704_v43, 0.0  ;;  %v1574_v57 = vmul.f32 %v3589_v53, %v4046_v2  ;;  %v1508_v58 = vmul.f32 %v4046_v2, %v1110_v54  ;;  %v1366_v59 = vpop.f32.mrb[41].mxu1  ;;  %v3526_v60 = vpop.f32.mrb[42].mxu0 }
 0x141   : > { %v3288_v55 = vpack.c.bf16 %v1834_v46, %v1833_v44  ;;  %v3123_v56 = vpack.c.bf16 %v1768_v47, %v1767_v45  ;;  %v1645_v62 = vadd.f32 %v4051_v4, %v1510_v52  ;;  %v1572_v63 = vmul.f32 %v4046_v2, %v1366_v59  ;;  %v3590_v1 = vpop.f32.mrb[42].mxu1  ;;  %v1113_v3 = vpop.f32.mrb[43].mxu0 }
 0x142   : > { %3368 = vst [vmem:[%s4075_s26 + $0x98] sm:$0xff] %v3128_v50   ;;  %v3283_v61 = vpack.c.bf16 %v1832_v51, %v1831_v49  ;;  %v1511_v0 = vmul.f32 %v3526_v60, %v4046_v2  ;;  %v1709_v5 = vadd.f32 %v4051_v4, %v1574_v57  ;;  %v1643_v6 = vadd.f32 %v4051_v4, %v1508_v58  ;;  %v1369_v9 = vpop.f32.mrb[43].mxu1 }
 0x143   : > { %3400 = vst [vmem:[%s4075_s26 + $0x198] sm:$0xff] %v3288_v55   ;;  %3367 = vst [vmem:[%s4075_s26 + $0x90] sm:$0xff] %v3123_v56   ;;  %v1575_v7 = vmul.f32 %v3590_v1, %v4046_v2  ;;  %v1509_v8 = vmul.f32 %v4046_v2, %v1113_v3  ;;  %v1707_v10 = vadd.f32 %v4051_v4, %v1572_v63  ;;  %v1773_v15 = vmax.f32 %v1645_v62, 0.0 }
 0x144   : > { %3399 = vst [vmem:[%s4075_s26 + $0x190] sm:$0xff] %v3283_v61   ;;  %v1646_v11 = vadd.f32 %v4051_v4, %v1511_v0  ;;  %v1573_v12 = vmul.f32 %v4046_v2, %v1369_v9  ;;  %v1837_v18 = vmax.f32 %v1709_v5, 0.0  ;;  %v1771_v19 = vmax.f32 %v1643_v6, 0.0 }
 0x145   : > { %v1710_v13 = vadd.f32 %v4051_v4, %v1575_v7  ;;  %v1644_v14 = vadd.f32 %v4051_v4, %v1509_v8  ;;  %v1835_v23 = vmax.f32 %v1707_v10, 0.0 }
 0x146   : > { %v1774_v16 = vmax.f32 %v1646_v11, 0.0  ;;  %v1708_v17 = vadd.f32 %v4051_v4, %v1573_v12  ;;  %v3529_v22 = vpop.f32.mrb[44].mxu0 }
 0x147   : > { %v1838_v20 = vmax.f32 %v1710_v13, 0.0  ;;  %v1772_v21 = vmax.f32 %v1644_v14, 0.0  ;;  %v1514_v26 = vmul.f32 %v3529_v22, %v4046_v2  ;;  %v3593_v27 = vpop.f32.mrb[44].mxu1  ;;  %v1126_v28 = vpop.f32.mrb[45].mxu0 }
 0x148   : > { %v3138_v24 = vpack.c.bf16 %v1774_v16, %v1773_v15  ;;  %v1836_v25 = vmax.f32 %v1708_v17, 0.0  ;;  %v1578_v31 = vmul.f32 %v3593_v27, %v4046_v2  ;;  %v1512_v32 = vmul.f32 %v4046_v2, %v1126_v28  ;;  %v1382_v33 = vpop.f32.mrb[45].mxu1  ;;  %v3530_v34 = vpop.f32.mrb[46].mxu0 }
 0x149   : > { %v3298_v29 = vpack.c.bf16 %v1838_v20, %v1837_v18  ;;  %v3133_v30 = vpack.c.bf16 %v1772_v21, %v1771_v19  ;;  %v1649_v36 = vadd.f32 %v4051_v4, %v1514_v26  ;;  %v1576_v37 = vmul.f32 %v4046_v2, %v1382_v33  ;;  %v3594_v39 = vpop.f32.mrb[46].mxu1  ;;  %v1129_v40 = vpop.f32.mrb[47].mxu0 }
 0x14a   : > { %3370 = vst [vmem:[%s4075_s26 + $0xa8] sm:$0xff] %v3138_v24   ;;  %v3293_v35 = vpack.c.bf16 %v1836_v25, %v1835_v23  ;;  %v1515_v38 = vmul.f32 %v3530_v34, %v4046_v2  ;;  %v1713_v41 = vadd.f32 %v4051_v4, %v1578_v31  ;;  %v1647_v42 = vadd.f32 %v4051_v4, %v1512_v32  ;;  %v1385_v45 = vpop.f32.mrb[47].mxu1 }
 0x14b   : > { %3402 = vst [vmem:[%s4075_s26 + $0x1a8] sm:$0xff] %v3298_v29   ;;  %3369 = vst [vmem:[%s4075_s26 + $0xa0] sm:$0xff] %v3133_v30   ;;  %v1579_v43 = vmul.f32 %v3594_v39, %v4046_v2  ;;  %v1513_v44 = vmul.f32 %v4046_v2, %v1129_v40  ;;  %v1711_v46 = vadd.f32 %v4051_v4, %v1576_v37  ;;  %v1777_v51 = vmax.f32 %v1649_v36, 0.0 }
 0x14c   : > { %3401 = vst [vmem:[%s4075_s26 + $0x1a0] sm:$0xff] %v3293_v35   ;;  %v1650_v47 = vadd.f32 %v4051_v4, %v1515_v38  ;;  %v1577_v48 = vmul.f32 %v4046_v2, %v1385_v45  ;;  %v1841_v54 = vmax.f32 %v1713_v41, 0.0  ;;  %v1775_v55 = vmax.f32 %v1647_v42, 0.0  ;;  %v4326_v45 = vld [vmem:[%s4448_s3] ss:$0 sm:$0xff] }
 0x14d   : > { %v1714_v49 = vadd.f32 %v4051_v4, %v1579_v43  ;;  %v1648_v50 = vadd.f32 %v4051_v4, %v1513_v44  ;;  %v1839_v59 = vmax.f32 %v1711_v46, 0.0 }
 0x14e   : > { %v1778_v52 = vmax.f32 %v1650_v47, 0.0  ;;  %v1712_v53 = vadd.f32 %v4051_v4, %v1577_v48  ;;  %v3533_v58 = vpop.f32.mrb[48].mxu0 }
 0x14f   : > { %v1842_v56 = vmax.f32 %v1714_v49, 0.0  ;;  %v1776_v57 = vmax.f32 %v1648_v50, 0.0  ;;  %v1518_v62 = vmul.f32 %v3533_v58, %v4046_v2  ;;  %v3597_v63 = vpop.f32.mrb[48].mxu1  ;;  %v1142_v0 = vpop.f32.mrb[49].mxu0 }
 0x150   : > { %v3148_v60 = vpack.c.bf16 %v1778_v52, %v1777_v51  ;;  %v1840_v61 = vmax.f32 %v1712_v53, 0.0  ;;  %v1582_v5 = vmul.f32 %v3597_v63, %v4046_v2  ;;  %v1516_v6 = vmul.f32 %v4046_v2, %v1142_v0  ;;  %v1398_v7 = vpop.f32.mrb[49].mxu1  ;;  %v3534_v8 = vpop.f32.mrb[50].mxu0 }
 0x151   : > { %v3308_v1 = vpack.c.bf16 %v1842_v56, %v1841_v54  ;;  %v3143_v3 = vpack.c.bf16 %v1776_v57, %v1775_v55  ;;  %v1653_v10 = vadd.f32 %v4051_v4, %v1518_v62  ;;  %v1580_v11 = vmul.f32 %v4046_v2, %v1398_v7  ;;  %v3598_v13 = vpop.f32.mrb[50].mxu1  ;;  %v1145_v14 = vpop.f32.mrb[51].mxu0 }
 0x152   : > { %3372 = vst [vmem:[%s4075_s26 + $0xb8] sm:$0xff] %v3148_v60   ;;  %v3303_v9 = vpack.c.bf16 %v1840_v61, %v1839_v59  ;;  %v1519_v12 = vmul.f32 %v3534_v8, %v4046_v2  ;;  %v1717_v15 = vadd.f32 %v4051_v4, %v1582_v5  ;;  %v1651_v16 = vadd.f32 %v4051_v4, %v1516_v6  ;;  %v1401_v19 = vpop.f32.mrb[51].mxu1 }
 0x153   : > { %3404 = vst [vmem:[%s4075_s26 + $0x1b8] sm:$0xff] %v3308_v1   ;;  %3371 = vst [vmem:[%s4075_s26 + $0xb0] sm:$0xff] %v3143_v3   ;;  %v1583_v17 = vmul.f32 %v3598_v13, %v4046_v2  ;;  %v1517_v18 = vmul.f32 %v4046_v2, %v1145_v14  ;;  %v1715_v20 = vadd.f32 %v4051_v4, %v1580_v11  ;;  %v1781_v25 = vmax.f32 %v1653_v10, 0.0 }
 0x154   : > { %3403 = vst [vmem:[%s4075_s26 + $0x1b0] sm:$0xff] %v3303_v9   ;;  %v1654_v21 = vadd.f32 %v4051_v4, %v1519_v12  ;;  %v1581_v22 = vmul.f32 %v4046_v2, %v1401_v19  ;;  %v1845_v28 = vmax.f32 %v1717_v15, 0.0  ;;  %v1779_v29 = vmax.f32 %v1651_v16, 0.0  ;;  %v4317_v2 = vld [vmem:[%s4447_s2] ss:$0 sm:$0xff] }
 0x155   : > { %v1718_v23 = vadd.f32 %v4051_v4, %v1583_v17  ;;  %v1652_v24 = vadd.f32 %v4051_v4, %v1517_v18  ;;  %v1843_v33 = vmax.f32 %v1715_v20, 0.0 }
 0x156   : > { %v1782_v26 = vmax.f32 %v1654_v21, 0.0  ;;  %v1716_v27 = vadd.f32 %v4051_v4, %v1581_v22  ;;  %v3537_v32 = vpop.f32.mrb[52].mxu0 }
 0x157   : > { %v1846_v30 = vmax.f32 %v1718_v23, 0.0  ;;  %v1780_v31 = vmax.f32 %v1652_v24, 0.0  ;;  %v1522_v36 = vmul.f32 %v4317_v2, %v3537_v32  ;;  %v3601_v37 = vpop.f32.mrb[52].mxu1  ;;  %v1158_v38 = vpop.f32.mrb[53].mxu0 }
 0x158   : > { %v3158_v34 = vpack.c.bf16 %v1782_v26, %v1781_v25  ;;  %v1844_v35 = vmax.f32 %v1716_v27, 0.0  ;;  %v1586_v40 = vmul.f32 %v4317_v2, %v3601_v37  ;;  %v1520_v41 = vmul.f32 %v4317_v2, %v1158_v38  ;;  %v1414_v42 = vpop.f32.mrb[53].mxu1  ;;  %v3538_v43 = vpop.f32.mrb[54].mxu0 }
 0x159   : > { %v3318_v4 = vpack.c.bf16 %v1846_v30, %v1845_v28  ;;  %v3153_v39 = vpack.c.bf16 %v1780_v31, %v1779_v29  ;;  %v1657_v46 = vadd.f32 %v4326_v45, %v1522_v36  ;;  %v1584_v47 = vmul.f32 %v4317_v2, %v1414_v42  ;;  %v3602_v49 = vpop.f32.mrb[54].mxu1  ;;  %v1161_v50 = vpop.f32.mrb[55].mxu0 }
 0x15a   : > { %3374 = vst [vmem:[%s4075_s26 + $0xc8] sm:$0xff] %v3158_v34   ;;  %v3313_v44 = vpack.c.bf16 %v1844_v35, %v1843_v33  ;;  %v1523_v48 = vmul.f32 %v4317_v2, %v3538_v43  ;;  %v1721_v51 = vadd.f32 %v4326_v45, %v1586_v40  ;;  %v1655_v52 = vadd.f32 %v4326_v45, %v1520_v41  ;;  %v1417_v55 = vpop.f32.mrb[55].mxu1 }
 0x15b   : > { %3406 = vst [vmem:[%s4075_s26 + $0x1c8] sm:$0xff] %v3318_v4   ;;  %3373 = vst [vmem:[%s4075_s26 + $0xc0] sm:$0xff] %v3153_v39   ;;  %v1587_v53 = vmul.f32 %v4317_v2, %v3602_v49  ;;  %v1521_v54 = vmul.f32 %v4317_v2, %v1161_v50  ;;  %v1719_v56 = vadd.f32 %v4326_v45, %v1584_v47  ;;  %v1785_v61 = vmax.f32 %v1657_v46, 0.0 }
 0x15c   : > { %3405 = vst [vmem:[%s4075_s26 + $0x1c0] sm:$0xff] %v3313_v44   ;;  %v1658_v57 = vadd.f32 %v4326_v45, %v1523_v48  ;;  %v1585_v58 = vmul.f32 %v4317_v2, %v1417_v55  ;;  %v1849_v0 = vmax.f32 %v1721_v51, 0.0  ;;  %v1783_v1 = vmax.f32 %v1655_v52, 0.0 }
 0x15d   : > { %v1722_v59 = vadd.f32 %v4326_v45, %v1587_v53  ;;  %v1656_v60 = vadd.f32 %v4326_v45, %v1521_v54  ;;  %v1847_v7 = vmax.f32 %v1719_v56, 0.0 }
 0x15e   : > { %v1786_v62 = vmax.f32 %v1658_v57, 0.0  ;;  %v1720_v63 = vadd.f32 %v4326_v45, %v1585_v58  ;;  %v3541_v6 = vpop.f32.mrb[56].mxu0 }
 0x15f   : > { %v1850_v3 = vmax.f32 %v1722_v59, 0.0  ;;  %v1784_v5 = vmax.f32 %v1656_v60, 0.0  ;;  %v1526_v10 = vmul.f32 %v4317_v2, %v3541_v6  ;;  %v3605_v11 = vpop.f32.mrb[56].mxu1  ;;  %v1174_v12 = vpop.f32.mrb[57].mxu0 }
 0x160   : > { %v3168_v8 = vpack.c.bf16 %v1786_v62, %v1785_v61  ;;  %v1848_v9 = vmax.f32 %v1720_v63, 0.0  ;;  %v1590_v15 = vmul.f32 %v4317_v2, %v3605_v11  ;;  %v1524_v16 = vmul.f32 %v4317_v2, %v1174_v12  ;;  %v1430_v17 = vpop.f32.mrb[57].mxu1  ;;  %v3542_v18 = vpop.f32.mrb[58].mxu0 }
 0x161   : > { %v3328_v13 = vpack.c.bf16 %v1850_v3, %v1849_v0  ;;  %v3163_v14 = vpack.c.bf16 %v1784_v5, %v1783_v1  ;;  %v1661_v20 = vadd.f32 %v4326_v45, %v1526_v10  ;;  %v1588_v21 = vmul.f32 %v4317_v2, %v1430_v17  ;;  %v3606_v23 = vpop.f32.mrb[58].mxu1  ;;  %v1177_v24 = vpop.f32.mrb[59].mxu0 }
 0x162   : > { %3376 = vst [vmem:[%s4075_s26 + $0xd8] sm:$0xff] %v3168_v8   ;;  %v3323_v19 = vpack.c.bf16 %v1848_v9, %v1847_v7  ;;  %v1527_v22 = vmul.f32 %v4317_v2, %v3542_v18  ;;  %v1725_v25 = vadd.f32 %v4326_v45, %v1590_v15  ;;  %v1659_v26 = vadd.f32 %v4326_v45, %v1524_v16  ;;  %v1433_v29 = vpop.f32.mrb[59].mxu1 }
 0x163   : > { %3408 = vst [vmem:[%s4075_s26 + $0x1d8] sm:$0xff] %v3328_v13   ;;  %3375 = vst [vmem:[%s4075_s26 + $0xd0] sm:$0xff] %v3163_v14   ;;  %v1591_v27 = vmul.f32 %v4317_v2, %v3606_v23  ;;  %v1525_v28 = vmul.f32 %v4317_v2, %v1177_v24  ;;  %v1723_v30 = vadd.f32 %v4326_v45, %v1588_v21  ;;  %v1789_v35 = vmax.f32 %v1661_v20, 0.0 }
 0x164   : > { %3407 = vst [vmem:[%s4075_s26 + $0x1d0] sm:$0xff] %v3323_v19   ;;  %v1662_v31 = vadd.f32 %v4326_v45, %v1527_v22  ;;  %v1589_v32 = vmul.f32 %v4317_v2, %v1433_v29  ;;  %v1853_v38 = vmax.f32 %v1725_v25, 0.0  ;;  %v1787_v4 = vmax.f32 %v1659_v26, 0.0 }
 0x165   : > { %v1726_v33 = vadd.f32 %v4326_v45, %v1591_v27  ;;  %v1660_v34 = vadd.f32 %v4326_v45, %v1525_v28  ;;  %v1851_v42 = vmax.f32 %v1723_v30, 0.0 }
 0x166   : > { %v1790_v36 = vmax.f32 %v1662_v31, 0.0  ;;  %v1724_v37 = vadd.f32 %v4326_v45, %v1589_v32  ;;  %v3545_v41 = vpop.f32.mrb[60].mxu0 }
 0x167   : > { %v1854_v39 = vmax.f32 %v1726_v33, 0.0  ;;  %v1788_v40 = vmax.f32 %v1660_v34, 0.0  ;;  %v1530_v46 = vmul.f32 %v4317_v2, %v3545_v41  ;;  %v3609_v47 = vpop.f32.mrb[60].mxu1  ;;  %v1190_v48 = vpop.f32.mrb[61].mxu0 }
 0x168   : > { %v3178_v43 = vpack.c.bf16 %v1790_v36, %v1789_v35  ;;  %v1852_v44 = vmax.f32 %v1724_v37, 0.0  ;;  %v1594_v51 = vmul.f32 %v4317_v2, %v3609_v47  ;;  %v1528_v52 = vmul.f32 %v4317_v2, %v1190_v48  ;;  %v1446_v53 = vpop.f32.mrb[61].mxu1  ;;  %v3546_v54 = vpop.f32.mrb[62].mxu0 }
 0x169   : > { %v3338_v49 = vpack.c.bf16 %v1854_v39, %v1853_v38  ;;  %v3173_v50 = vpack.c.bf16 %v1788_v40, %v1787_v4  ;;  %v1665_v56 = vadd.f32 %v4326_v45, %v1530_v46  ;;  %v1592_v57 = vmul.f32 %v4317_v2, %v1446_v53  ;;  %v3610_v59 = vpop.f32.mrb[62].mxu1  ;;  %v1193_v60 = vpop.f32.mrb[63].mxu0 }
 0x16a   : > { %3378 = vst [vmem:[%s4075_s26 + $0xe8] sm:$0xff] %v3178_v43   ;;  %v3333_v55 = vpack.c.bf16 %v1852_v44, %v1851_v42  ;;  %v1531_v58 = vmul.f32 %v4317_v2, %v3546_v54  ;;  %v1729_v61 = vadd.f32 %v4326_v45, %v1594_v51  ;;  %v1663_v62 = vadd.f32 %v4326_v45, %v1528_v52  ;;  %v1449_v1 = vpop.f32.mrb[63].mxu1 }
 0x16b   : > { %3410 = vst [vmem:[%s4075_s26 + $0x1e8] sm:$0xff] %v3338_v49   ;;  %3377 = vst [vmem:[%s4075_s26 + $0xe0] sm:$0xff] %v3173_v50   ;;  %v1595_v63 = vmul.f32 %v4317_v2, %v3610_v59  ;;  %v1529_v0 = vmul.f32 %v4317_v2, %v1193_v60  ;;  %v1727_v3 = vadd.f32 %v4326_v45, %v1592_v57  ;;  %v1793_v9 = vmax.f32 %v1665_v56, 0.0 }
 0x16c   : > { %3409 = vst [vmem:[%s4075_s26 + $0x1e0] sm:$0xff] %v3333_v55   ;;  %v1666_v5 = vadd.f32 %v4326_v45, %v1531_v58  ;;  %v1593_v6 = vmul.f32 %v4317_v2, %v1449_v1  ;;  %v1857_v12 = vmax.f32 %v1729_v61, 0.0  ;;  %v1791_v13 = vmax.f32 %v1663_v62, 0.0 }
 0x16d   : > { %v1730_v7 = vadd.f32 %v4326_v45, %v1595_v63  ;;  %v1664_v8 = vadd.f32 %v4326_v45, %v1529_v0  ;;  %v1855_v2 = vmax.f32 %v1727_v3, 0.0 }
 0x16e   : > { %v1794_v10 = vmax.f32 %v1666_v5, 0.0  ;;  %v1728_v11 = vadd.f32 %v4326_v45, %v1593_v6 }
 0x16f   : > { %v1858_v14 = vmax.f32 %v1730_v7, 0.0  ;;  %v1792_v15 = vmax.f32 %v1664_v8, 0.0 }
 0x170   : > { %v3188_v16 = vpack.c.bf16 %v1794_v10, %v1793_v9  ;;  %v1856_v17 = vmax.f32 %v1728_v11, 0.0 }
 0x171   : > { %v3348_v18 = vpack.c.bf16 %v1858_v14, %v1857_v12  ;;  %v3183_v19 = vpack.c.bf16 %v1792_v15, %v1791_v13 }
 0x172   : > { %3380 = vst [vmem:[%s4075_s26 + $0xf8] sm:$0xff] %v3188_v16   ;;  %v3343_v45 = vpack.c.bf16 %v1856_v17, %v1855_v2 }
 0x173   : > { %3412 = vst [vmem:[%s4075_s26 + $0x1f8] sm:$0xff] %v3348_v18   ;;  %3379 = vst [vmem:[%s4075_s26 + $0xf0] sm:$0xff] %v3183_v19  }
 0x174   : > { %3411 = vst [vmem:[%s4075_s26 + $0x1f0] sm:$0xff] %v3343_v45  }
 0x175   : > { %3753 = shalt.err (!%p3750_p5)
}
 0x176   : > { %s3754_s22 = scalar_lea.hbm %s4389_s11, 8192  ;;  %s3758_s29 = scalar_lea.hbm %s4449_s4, 16384 }
 0x177   : > { %p3755_p6 = scmp.ne.s32.totalorder %s4389_s11, %s3754_s22  ;;  %p3759_p10 = scmp.lt.u32.totalorder %s4389_s11, %s4449_s4 }
 0x178   : > { %p3760_p11 = scmp.lt.u32.totalorder %s3758_s29, %s3754_s22  ;;  %p3762_p13 = scmp.lt.u32.totalorder %s3754_s22, %s4389_s11 }
 0x179   : > { %p3756_p7 = pnand %p3755_p6, %p3888_p4 }
 0x17a   : > { %p3761_p12 = por %p3760_p11, %p3759_p10 }
 0x17b   : > { %p3757_p9 = pneg %p3756_p7 }
 0x17c   : > { %p3763_p0 = por %p3762_p13, %p3761_p12 }
 0x17e   : > { %p3764_p1 = pnand %p3763_p0, %p3757_p9 }
 0x180   : > { %3767 = shalt.err (!%p3764_p1)
}
 0x181   : > { %s3821_s6 = smov 64   ;;  %s3822_s7 = smov 4  }
 0x182   : > { %3615 = dma.vmem_to_hbm [thread:$0]  (%p3888_p4), %s4391_s8, 8192, %s4389_s11, %s4399_s18, %s3821_s6, %s3821_s6, %s3822_s7  }
 0x183 PF: > { %p3621_p2 = scmp.ge.s32.totalorder %s3818_s20, 2  ;;  %s2529_s9 = sand.u32 1, %s3798_s15  }
 0x184   : > { %s2530_s10 = scalar_lea.sflag [#allocation3], %s2529_s9 }
 0x185   : > { %p3618_p3 = pnand %p3621_p2, %p3895_p8 }
 0x187   : > { %3793 = dma.done.wait (!%p3618_p3), %s2530_s10, 8192  }
 0x188   : > { %3795 = vsyncadd (!%p3618_p3), %s2530_s10, 4294959104  ;;  %s17_s20 = sadd.s32 1, %s3818_s20   ;;  %s4452_s15 = smov %s3802_s16 }
 0x189   : > { %p14_p5 = scmp.ge.s32.totalorder %s17_s20, 4   ;;  %s4453_s16 = smov %s3806_s17 }
 0x18a   : > { %s4454_s17 = smov %s3901_s28  ;;  %s4455_s18 = smov %s3814_s19 }
 0x18b   : > { %s4456_s19 = smov %s4458_s23  ;;  %16 = sbr.rel (!%p14_p5) target bundleno = 4 (0x4), region = 80 }
 0x192   :  { %2535 = vsyncpa [#allocation3], 1 }
 0x193   :  { %2537 = vsyncpa [#allocation3 + $0x1], 1 }

</bundles_post_ra>
